<compile_context>
chip_gen: v7x
topology: tpu7x:2x2x1
jax: 0.10.0
libtpu: 0.0.40
codegen_flags: <defaults>
</compile_context>

<pallas_src>
import math
import functools

import jax
import jax.numpy as jnp
from jax import lax
from jax.experimental import pallas as pl
from jax.experimental.pallas import tpu as pltpu


# --------------------- Fused flash-MHA kernel (per grid step) ---------------
def _flash_mha_kernel(q_ref, k_ref, v_ref,
                      wq_ref, bq_ref, wk_ref, bk_ref, wv_ref, bv_ref,
                      wo_ref, bo_ref,
                      o_ref,
                      qp_ref, m_ref, l_ref, acc_ref,
                      *, num_heads, d_k, scale):
    kv = pl.program_id(2)
    last_kv = pl.num_programs(2) - 1

    @pl.when(kv == 0)
    def _init():
        # Project + scale the Q tile once per (batch, q-block); cache it in the
        # bf16 form the MXU consumes.  Accumulator / softmax state reset.
        q = jnp.dot(q_ref[0].astype(jnp.bfloat16),
                    wq_ref[...].astype(jnp.bfloat16),
                    preferred_element_type=jnp.float32) + bq_ref[...]
        qp_ref[...] = (q * scale).astype(qp_ref.dtype)
        m_ref[...] = jnp.full(m_ref.shape, -jnp.inf, dtype=m_ref.dtype)
        l_ref[...] = jnp.zeros(l_ref.shape, dtype=l_ref.dtype)
        acc_ref[...] = jnp.zeros(acc_ref.shape, dtype=acc_ref.dtype)

    # Project the current K/V tile (bf16 MXU operands, f32 accumulate + bias,
    # then back to bf16 for the attention matmuls).
    k = (jnp.dot(k_ref[0].astype(jnp.bfloat16),
                 wk_ref[...].astype(jnp.bfloat16),
                 preferred_element_type=jnp.float32)
         + bk_ref[...]).astype(jnp.bfloat16)
    v = (jnp.dot(v_ref[0].astype(jnp.bfloat16),
                 wv_ref[...].astype(jnp.bfloat16),
                 preferred_element_type=jnp.float32)
         + bv_ref[...]).astype(jnp.bfloat16)

    # Online softmax per head; heads stay packed along the lane axis.
    for h in range(num_heads):
        sl = slice(h * d_k, (h + 1) * d_k)
        qh = qp_ref[:, sl]          # (TQ, d_k) bf16, already scaled
        kh = k[:, sl]               # (TKV, d_k) bf16
        vh = v[:, sl]               # (TKV, d_k) bf16

        # scores = Qh . Kh^T — contract dim 1 of both operands (no K^T copy).
        s = lax.dot_general(qh, kh, (((1,), (1,)), ((), ())),
                            preferred_element_type=jnp.float32)   # (TQ, TKV) f32

        m_prev = m_ref[h]                                          # (TQ, 1)
        m_new = jnp.maximum(m_prev, jnp.max(s, axis=-1, keepdims=True))
        alpha = jnp.exp(m_prev - m_new)
        p = jnp.exp(s - m_new)                                     # (TQ, TKV) f32
        l_ref[h] = alpha * l_ref[h] + jnp.sum(p, axis=-1, keepdims=True)
        acc_ref[:, sl] = alpha * acc_ref[:, sl] + jnp.dot(
            p.astype(jnp.bfloat16), vh, preferred_element_type=jnp.float32)
        m_ref[h] = m_new

    @pl.when(kv == last_kv)
    def _finalize():
        # Normalize each head in place (reciprocal-multiply on the EUP), then
        # one lane-dense Wo matmul and a single HBM store per Q block.
        for h in range(num_heads):
            sl = slice(h * d_k, (h + 1) * d_k)
            acc_ref[:, sl] = acc_ref[:, sl] * pl.reciprocal(l_ref[h], approx=True)
        out = jnp.dot(acc_ref[...].astype(jnp.bfloat16),
                      wo_ref[...].astype(jnp.bfloat16),
                      preferred_element_type=jnp.float32) + bo_ref[...]
        o_ref[0] = out.astype(o_ref.dtype)


# ------------------------- Full module forward ------------------------------
def _pick_tile(s, target):
    """Largest multiple-of-8 divisor of s that is <= target, else s itself."""
    if s <= target:
        return s
    t = (target // 8) * 8
    while t >= 8:
        if s % t == 0:
            return t
        t -= 8
    return s


def multi_head_attention(query, key, value, params, num_heads, *,
                         tq=256, tkv=512):
    """Pallas-backed equivalent of MultiHeadAttention.forward (mask=None)."""
    B, S, D = query.shape
    assert D % num_heads == 0
    d_k = D // num_heads
    scale = 1.0 / math.sqrt(d_k)

    TQ = _pick_tile(S, tq)     # query tile (full S at demo shapes)
    TKV = _pick_tile(S, tkv)   # key/value tile (full S at demo shapes)

    q_spec = pl.BlockSpec((1, TQ, D), lambda b, qi, ki: (b, qi, 0))
    kv_spec = pl.BlockSpec((1, TKV, D), lambda b, qi, ki: (b, ki, 0))
    w_spec = pl.BlockSpec((D, D), lambda b, qi, ki: (0, 0))     # resident weights
    b_spec = pl.BlockSpec((1, D), lambda b, qi, ki: (0, 0))     # resident biases
    # Output: lane-dense (last dim = D), constant across the KV axis
    # (accumulator pattern — HBM written only by the finalize branch).
    o_spec = pl.BlockSpec((1, TQ, D), lambda b, qi, ki: (b, qi, 0))

    kernel = functools.partial(_flash_mha_kernel,
                               num_heads=num_heads, d_k=d_k, scale=scale)

    return pl.pallas_call(
        kernel,
        out_shape=jax.ShapeDtypeStruct((B, S, D), query.dtype),
        grid=(B, S // TQ, S // TKV),
        in_specs=[q_spec, kv_spec, kv_spec,
                  w_spec, b_spec,   # W_q, b_q
                  w_spec, b_spec,   # W_k, b_k
                  w_spec, b_spec,   # W_v, b_v
                  w_spec, b_spec],  # W_o, b_o
        out_specs=o_spec,
        scratch_shapes=[
            pltpu.VMEM((TQ, D), jnp.bfloat16),            # projected, scaled Q
            pltpu.VMEM((num_heads, TQ, 1), jnp.float32),  # running max m
            pltpu.VMEM((num_heads, TQ, 1), jnp.float32),  # running sum l
            pltpu.VMEM((TQ, D), jnp.float32),             # context accumulator
        ],
        compiler_params=pltpu.CompilerParams(
            dimension_semantics=("parallel", "parallel", "arbitrary"),
            vmem_limit_bytes=64 * 1024 * 1024),
    )(query, key, value,
      params["wq"], params["bq"].reshape(1, D),
      params["wk"], params["bk"].reshape(1, D),
      params["wv"], params["bv"].reshape(1, D),
      params["wo"], params["bo"].reshape(1, D))


# ----------------------------- Reference (pure JAX) -------------------------
def reference_mha(query, key, value, params, num_heads):
    B, S, d_model = query.shape
    d_k = d_model // num_heads

    def lin(x, w, b):
        return x @ w + b

    q = lin(query, params["wq"], params["bq"]).reshape(B, S, num_heads, d_k).transpose(0, 2, 1, 3)
    k = lin(key, params["wk"], params["bk"]).reshape(B, S, num_heads, d_k).transpose(0, 2, 1, 3)
    v = lin(value, params["wv"], params["bv"]).reshape(B, S, num_heads, d_k).transpose(0, 2, 1, 3)

    scores = jnp.einsum("bhqd,bhkd->bhqk", q, k) / math.sqrt(d_k)
    attn = jax.nn.softmax(scores, axis=-1)
    x = jnp.einsum("bhqk,bhkd->bhqd", attn, v)
    x = x.transpose(0, 2, 1, 3).reshape(B, S, d_model)
    return lin(x, params["wo"], params["bo"])


# ---------------------------------- Main ------------------------------------
if __name__ == "__main__":
    d_model = 32
    num_heads = 4
    batch = 2
    seq = 8

    key0 = jax.random.PRNGKey(0)
    keys = jax.random.split(key0, 12)

    bound = 1.0 / math.sqrt(d_model)  # torch nn.Linear default init range

    def init_linear(kw, kb):
        w = jax.random.uniform(kw, (d_model, d_model), jnp.float32, -bound, bound)
        b = jax.random.uniform(kb, (d_model,), jnp.float32, -bound, bound)
        return w, b

    wq, bq = init_linear(keys[0], keys[1])
    wk, bk = init_linear(keys[2], keys[3])
    wv, bv = init_linear(keys[4], keys[5])
    wo, bo = init_linear(keys[6], keys[7])
    params = dict(wq=wq, bq=bq, wk=wk, bk=bk, wv=wv, bv=bv, wo=wo, bo=bo)

    query = jax.random.normal(keys[8], (batch, seq, d_model), jnp.float32)
    key_in = jax.random.normal(keys[9], (batch, seq, d_model), jnp.float32)
    value = jax.random.normal(keys[10], (batch, seq, d_model), jnp.float32)

    out = multi_head_attention(query, key_in, value, params, num_heads)
    out = jax.block_until_ready(out)

    ref = reference_mha(query, key_in, value, params, num_heads)
    assert out.shape == (batch, seq, d_model)
    # bf16 MXU operands + approx reciprocal: looser tolerance than pure f32.
    assert jnp.allclose(out, ref, atol=2e-2, rtol=2e-2), "mismatch vs reference"

    print("KERNEL_OK")
</pallas_src>

<mosaic_0001>
module attributes {stable_mosaic.version = 11 : i64} {
  func.func @_flash_mha_kernel(%arg0: i32, %arg1: i32, %arg2: i32, %arg3: memref<1x8x32xf32, #tpu.memory_space<vmem>>, %arg4: memref<1x8x32xf32, #tpu.memory_space<vmem>>, %arg5: memref<1x8x32xf32, #tpu.memory_space<vmem>>, %arg6: memref<32x32xf32, #tpu.memory_space<vmem>>, %arg7: memref<1x32xf32, #tpu.memory_space<vmem>>, %arg8: memref<32x32xf32, #tpu.memory_space<vmem>>, %arg9: memref<1x32xf32, #tpu.memory_space<vmem>>, %arg10: memref<32x32xf32, #tpu.memory_space<vmem>>, %arg11: memref<1x32xf32, #tpu.memory_space<vmem>>, %arg12: memref<32x32xf32, #tpu.memory_space<vmem>>, %arg13: memref<1x32xf32, #tpu.memory_space<vmem>>, %arg14: memref<1x8x32xf32, #tpu.memory_space<vmem>>, %arg15: memref<8x32xbf16, #tpu.memory_space<vmem>>, %arg16: memref<4x8x1xf32, #tpu.memory_space<vmem>>, %arg17: memref<4x8x1xf32, #tpu.memory_space<vmem>>, %arg18: memref<8x32xf32, #tpu.memory_space<vmem>>) attributes {dimension_semantics = [#tpu.dimension_semantics<parallel>, #tpu.dimension_semantics<parallel>, #tpu.dimension_semantics<arbitrary>], iteration_bounds = array<i64: 2, 1, 1>, scalar_prefetch = 0 : i64, scratch_operands = 4 : i64, tpu.core_type = #tpu.core_type<tc>, window_params = [{transform_indices = @transform_0, window_bounds = array<i64: 1, 8, 32>}, {transform_indices = @transform_1, window_bounds = array<i64: 1, 8, 32>}, {transform_indices = @transform_2, window_bounds = array<i64: 1, 8, 32>}, {pipeline_mode = #tpu.pipeline_mode<synchronous>, transform_indices = @transform_3, window_bounds = array<i64: 32, 32>}, {pipeline_mode = #tpu.pipeline_mode<synchronous>, transform_indices = @transform_4, window_bounds = array<i64: 1, 32>}, {pipeline_mode = #tpu.pipeline_mode<synchronous>, transform_indices = @transform_5, window_bounds = array<i64: 32, 32>}, {pipeline_mode = #tpu.pipeline_mode<synchronous>, transform_indices = @transform_6, window_bounds = array<i64: 1, 32>}, {pipeline_mode = #tpu.pipeline_mode<synchronous>, transform_indices = @transform_7, window_bounds = array<i64: 32, 32>}, {pipeline_mode = #tpu.pipeline_mode<synchronous>, transform_indices = @transform_8, window_bounds = array<i64: 1, 32>}, {pipeline_mode = #tpu.pipeline_mode<synchronous>, transform_indices = @transform_9, window_bounds = array<i64: 32, 32>}, {pipeline_mode = #tpu.pipeline_mode<synchronous>, transform_indices = @transform_10, window_bounds = array<i64: 1, 32>}, {transform_indices = @transform_11, window_bounds = array<i64: 1, 8, 32>}]} {
    %c0_i32 = arith.constant 0 : i32
    %0 = arith.cmpi eq, %arg2, %c0_i32 : i32
    %1 = arith.extui %0 : i1 to i32
    %c0_i32_0 = arith.constant 0 : i32
    %2 = arith.cmpi ne, %1, %c0_i32_0 : i32
    scf.if %2 {
      %c0_99 = arith.constant 0 : index
      %c0_100 = arith.constant 0 : index
      %c0_101 = arith.constant 0 : index
      %158 = vector.load %arg3[%c0_99, %c0_100, %c0_101] : memref<1x8x32xf32, #tpu.memory_space<vmem>>, vector<1x8x32xf32>
      %159 = vector.shape_cast %158 : vector<1x8x32xf32> to vector<8x32xf32>
      %160 = arith.truncf %159 : vector<8x32xf32> to vector<8x32xbf16>
      %c0_102 = arith.constant 0 : index
      %c0_103 = arith.constant 0 : index
      %161 = vector.load %arg6[%c0_102, %c0_103] : memref<32x32xf32, #tpu.memory_space<vmem>>, vector<32x32xf32>
      %162 = arith.truncf %161 : vector<32x32xf32> to vector<32x32xbf16>
      %cst_104 = arith.constant dense<0.000000e+00> : vector<8x32xf32>
      %163 = tpu.matmul %160, %162, %cst_104 {dimension_numbers = #tpu.dot_dimension_numbers<[1], [0], [0], [1], [0, 0, 1, 1], [], []>} : vector<8x32xbf16>, vector<32x32xbf16>, vector<8x32xf32> -> vector<8x32xf32>
      %c0_105 = arith.constant 0 : index
      %c0_106 = arith.constant 0 : index
      %164 = vector.load %arg7[%c0_105, %c0_106] : memref<1x32xf32, #tpu.memory_space<vmem>>, vector<1x32xf32>
      %165 = vector.broadcast %164 : vector<1x32xf32> to vector<8x32xf32>
      %166 = arith.addf %163, %165 : vector<8x32xf32>
      %cst_107 = arith.constant 0.353553385 : f32
      %167 = vector.broadcast %cst_107 : f32 to vector<8x32xf32>
      %168 = arith.mulf %166, %167 : vector<8x32xf32>
      %169 = arith.truncf %168 : vector<8x32xf32> to vector<8x32xbf16>
      %c0_108 = arith.constant 0 : index
      %c0_109 = arith.constant 0 : index
      %170 = vector.load %arg15[%c0_108, %c0_109] : memref<8x32xbf16, #tpu.memory_space<vmem>>, vector<8x32xbf16>
      tpu.vector_store %arg15[%c0_108, %c0_109], %169 {strides = array<i32>} : memref<8x32xbf16, #tpu.memory_space<vmem>>, vector<8x32xbf16>,
      %cst_110 = arith.constant 0xFF800000 : f32
      %171 = vector.broadcast %cst_110 : f32 to vector<4x8x1xf32>
      %c0_111 = arith.constant 0 : index
      %c0_112 = arith.constant 0 : index
      %c0_113 = arith.constant 0 : index
      %172 = vector.load %arg16[%c0_111, %c0_112, %c0_113] : memref<4x8x1xf32, #tpu.memory_space<vmem>>, vector<4x8x1xf32>
      tpu.vector_store %arg16[%c0_111, %c0_112, %c0_113], %171 {strides = array<i32>} : memref<4x8x1xf32, #tpu.memory_space<vmem>>, vector<4x8x1xf32>,
      %cst_114 = arith.constant 0.000000e+00 : f32
      %173 = vector.broadcast %cst_114 : f32 to vector<4x8x1xf32>
      %c0_115 = arith.constant 0 : index
      %c0_116 = arith.constant 0 : index
      %c0_117 = arith.constant 0 : index
      %174 = vector.load %arg17[%c0_115, %c0_116, %c0_117] : memref<4x8x1xf32, #tpu.memory_space<vmem>>, vector<4x8x1xf32>
      tpu.vector_store %arg17[%c0_115, %c0_116, %c0_117], %173 {strides = array<i32>} : memref<4x8x1xf32, #tpu.memory_space<vmem>>, vector<4x8x1xf32>,
      %cst_118 = arith.constant 0.000000e+00 : f32
      %175 = vector.broadcast %cst_118 : f32 to vector<8x32xf32>
      %c0_119 = arith.constant 0 : index
      %c0_120 = arith.constant 0 : index
      %176 = vector.load %arg18[%c0_119, %c0_120] : memref<8x32xf32, #tpu.memory_space<vmem>>, vector<8x32xf32>
      tpu.vector_store %arg18[%c0_119, %c0_120], %175 {strides = array<i32>} : memref<8x32xf32, #tpu.memory_space<vmem>>, vector<8x32xf32>,
    } else {
    }
    %c0 = arith.constant 0 : index
    %c0_1 = arith.constant 0 : index
    %c0_2 = arith.constant 0 : index
    %3 = vector.load %arg4[%c0, %c0_1, %c0_2] : memref<1x8x32xf32, #tpu.memory_space<vmem>>, vector<1x8x32xf32>
    %4 = vector.shape_cast %3 : vector<1x8x32xf32> to vector<8x32xf32>
    %5 = arith.truncf %4 : vector<8x32xf32> to vector<8x32xbf16>
    %c0_3 = arith.constant 0 : index
    %c0_4 = arith.constant 0 : index
    %6 = vector.load %arg8[%c0_3, %c0_4] : memref<32x32xf32, #tpu.memory_space<vmem>>, vector<32x32xf32>
    %7 = arith.truncf %6 : vector<32x32xf32> to vector<32x32xbf16>
    %cst = arith.constant dense<0.000000e+00> : vector<8x32xf32>
    %8 = tpu.matmul %5, %7, %cst {dimension_numbers = #tpu.dot_dimension_numbers<[1], [0], [0], [1], [0, 0, 1, 1], [], []>} : vector<8x32xbf16>, vector<32x32xbf16>, vector<8x32xf32> -> vector<8x32xf32>
    %c0_5 = arith.constant 0 : index
    %c0_6 = arith.constant 0 : index
    %9 = vector.load %arg9[%c0_5, %c0_6] : memref<1x32xf32, #tpu.memory_space<vmem>>, vector<1x32xf32>
    %10 = vector.broadcast %9 : vector<1x32xf32> to vector<8x32xf32>
    %11 = arith.addf %8, %10 : vector<8x32xf32>
    %12 = arith.truncf %11 : vector<8x32xf32> to vector<8x32xbf16>
    %c0_7 = arith.constant 0 : index
    %c0_8 = arith.constant 0 : index
    %c0_9 = arith.constant 0 : index
    %13 = vector.load %arg5[%c0_7, %c0_8, %c0_9] : memref<1x8x32xf32, #tpu.memory_space<vmem>>, vector<1x8x32xf32>
    %14 = vector.shape_cast %13 : vector<1x8x32xf32> to vector<8x32xf32>
    %15 = arith.truncf %14 : vector<8x32xf32> to vector<8x32xbf16>
    %c0_10 = arith.constant 0 : index
    %c0_11 = arith.constant 0 : index
    %16 = vector.load %arg10[%c0_10, %c0_11] : memref<32x32xf32, #tpu.memory_space<vmem>>, vector<32x32xf32>
    %17 = arith.truncf %16 : vector<32x32xf32> to vector<32x32xbf16>
    %cst_12 = arith.constant dense<0.000000e+00> : vector<8x32xf32>
    %18 = tpu.matmul %15, %17, %cst_12 {dimension_numbers = #tpu.dot_dimension_numbers<[1], [0], [0], [1], [0, 0, 1, 1], [], []>} : vector<8x32xbf16>, vector<32x32xbf16>, vector<8x32xf32> -> vector<8x32xf32>
    %c0_13 = arith.constant 0 : index
    %c0_14 = arith.constant 0 : index
    %19 = vector.load %arg11[%c0_13, %c0_14] : memref<1x32xf32, #tpu.memory_space<vmem>>, vector<1x32xf32>
    %20 = vector.broadcast %19 : vector<1x32xf32> to vector<8x32xf32>
    %21 = arith.addf %18, %20 : vector<8x32xf32>
    %22 = arith.truncf %21 : vector<8x32xf32> to vector<8x32xbf16>
    %c0_15 = arith.constant 0 : index
    %c0_16 = arith.constant 0 : index
    %23 = vector.load %arg15[%c0_15, %c0_16] : memref<8x32xbf16, #tpu.memory_space<vmem>>, vector<8x8xbf16>
    %24 = vector.extract_strided_slice %12 {offsets = [0, 0], sizes = [8, 8], strides = [1, 1]} : vector<8x32xbf16> to vector<8x8xbf16>
    %25 = vector.extract_strided_slice %22 {offsets = [0, 0], sizes = [8, 8], strides = [1, 1]} : vector<8x32xbf16> to vector<8x8xbf16>
    %cst_17 = arith.constant dense<0.000000e+00> : vector<8x8xf32>
    %26 = tpu.matmul %23, %24, %cst_17 {dimension_numbers = #tpu.dot_dimension_numbers<[1], [1], [0], [0], [0, 0, 1, 0], [], []>} : vector<8x8xbf16>, vector<8x8xbf16>, vector<8x8xf32> -> vector<8x8xf32>
    %c0_18 = arith.constant 0 : index
    %c0_19 = arith.constant 0 : index
    %c0_20 = arith.constant 0 : index
    %27 = vector.load %arg16[%c0_18, %c0_19, %c0_20] : memref<4x8x1xf32, #tpu.memory_space<vmem>>, vector<1x8x1xf32>
    %28 = vector.shape_cast %27 : vector<1x8x1xf32> to vector<8x1xf32>
    %cst_21 = arith.constant dense<0xFF800000> : vector<8xf32>
    %29 = vector.multi_reduction <maximumf>, %26, %cst_21 [1] : vector<8x8xf32> to vector<8xf32>
    %30 = vector.shape_cast %29 : vector<8xf32> to vector<8x1xf32>
    %31 = arith.maximumf %28, %30 : vector<8x1xf32>
    %32 = arith.subf %28, %31 : vector<8x1xf32>
    %33 = math.exp %32 : vector<8x1xf32>
    %34 = vector.broadcast %31 : vector<8x1xf32> to vector<8x8xf32>
    %35 = arith.subf %26, %34 : vector<8x8xf32>
    %36 = math.exp %35 : vector<8x8xf32>
    %c0_22 = arith.constant 0 : index
    %c0_23 = arith.constant 0 : index
    %c0_24 = arith.constant 0 : index
    %37 = vector.load %arg17[%c0_22, %c0_23, %c0_24] : memref<4x8x1xf32, #tpu.memory_space<vmem>>, vector<1x8x1xf32>
    %38 = vector.shape_cast %37 : vector<1x8x1xf32> to vector<8x1xf32>
    %39 = arith.mulf %33, %38 : vector<8x1xf32>
    %cst_25 = arith.constant dense<0.000000e+00> : vector<8xf32>
    %40 = vector.multi_reduction <add>, %36, %cst_25 [1] : vector<8x8xf32> to vector<8xf32>
    %41 = vector.shape_cast %40 : vector<8xf32> to vector<8x1xf32>
    %42 = arith.addf %39, %41 : vector<8x1xf32>
    %c0_26 = arith.constant 0 : index
    %c0_27 = arith.constant 0 : index
    %c0_28 = arith.constant 0 : index
    %43 = vector.load %arg17[%c0_26, %c0_27, %c0_28] : memref<4x8x1xf32, #tpu.memory_space<vmem>>, vector<1x8x1xf32>
    %44 = vector.shape_cast %43 : vector<1x8x1xf32> to vector<8x1xf32>
    %45 = vector.shape_cast %42 : vector<8x1xf32> to vector<1x8x1xf32>
    tpu.vector_store %arg17[%c0_26, %c0_27, %c0_28], %45 {strides = array<i32>} : memref<4x8x1xf32, #tpu.memory_space<vmem>>, vector<1x8x1xf32>,
    %c0_29 = arith.constant 0 : index
    %c0_30 = arith.constant 0 : index
    %46 = vector.load %arg18[%c0_29, %c0_30] : memref<8x32xf32, #tpu.memory_space<vmem>>, vector<8x8xf32>
    %47 = vector.broadcast %33 : vector<8x1xf32> to vector<8x8xf32>
    %48 = arith.mulf %47, %46 : vector<8x8xf32>
    %49 = arith.truncf %36 : vector<8x8xf32> to vector<8x8xbf16>
    %cst_31 = arith.constant dense<0.000000e+00> : vector<8x8xf32>
    %50 = tpu.matmul %49, %25, %cst_31 {dimension_numbers = #tpu.dot_dimension_numbers<[1], [0], [0], [1], [0, 0, 1, 1], [], []>} : vector<8x8xbf16>, vector<8x8xbf16>, vector<8x8xf32> -> vector<8x8xf32>
    %51 = arith.addf %48, %50 : vector<8x8xf32>
    %c0_32 = arith.constant 0 : index
    %c0_33 = arith.constant 0 : index
    %52 = vector.load %arg18[%c0_32, %c0_33] : memref<8x32xf32, #tpu.memory_space<vmem>>, vector<8x8xf32>
    tpu.vector_store %arg18[%c0_32, %c0_33], %51 {strides = array<i32>} : memref<8x32xf32, #tpu.memory_space<vmem>>, vector<8x8xf32>,
    %c0_34 = arith.constant 0 : index
    %c0_35 = arith.constant 0 : index
    %c0_36 = arith.constant 0 : index
    %53 = vector.load %arg16[%c0_34, %c0_35, %c0_36] : memref<4x8x1xf32, #tpu.memory_space<vmem>>, vector<1x8x1xf32>
    %54 = vector.shape_cast %53 : vector<1x8x1xf32> to vector<8x1xf32>
    %55 = vector.shape_cast %31 : vector<8x1xf32> to vector<1x8x1xf32>
    tpu.vector_store %arg16[%c0_34, %c0_35, %c0_36], %55 {strides = array<i32>} : memref<4x8x1xf32, #tpu.memory_space<vmem>>, vector<1x8x1xf32>,
    %c0_37 = arith.constant 0 : index
    %c8 = arith.constant 8 : index
    %56 = vector.load %arg15[%c0_37, %c8] : memref<8x32xbf16, #tpu.memory_space<vmem>>, vector<8x8xbf16>
    %57 = vector.extract_strided_slice %12 {offsets = [0, 8], sizes = [8, 8], strides = [1, 1]} : vector<8x32xbf16> to vector<8x8xbf16>
    %58 = vector.extract_strided_slice %22 {offsets = [0, 8], sizes = [8, 8], strides = [1, 1]} : vector<8x32xbf16> to vector<8x8xbf16>
    %cst_38 = arith.constant dense<0.000000e+00> : vector<8x8xf32>
    %59 = tpu.matmul %56, %57, %cst_38 {dimension_numbers = #tpu.dot_dimension_numbers<[1], [1], [0], [0], [0, 0, 1, 0], [], []>} : vector<8x8xbf16>, vector<8x8xbf16>, vector<8x8xf32> -> vector<8x8xf32>
    %c1 = arith.constant 1 : index
    %c0_39 = arith.constant 0 : index
    %c0_40 = arith.constant 0 : index
    %60 = vector.load %arg16[%c1, %c0_39, %c0_40] : memref<4x8x1xf32, #tpu.memory_space<vmem>>, vector<1x8x1xf32>
    %61 = vector.shape_cast %60 : vector<1x8x1xf32> to vector<8x1xf32>
    %cst_41 = arith.constant dense<0xFF800000> : vector<8xf32>
    %62 = vector.multi_reduction <maximumf>, %59, %cst_41 [1] : vector<8x8xf32> to vector<8xf32>
    %63 = vector.shape_cast %62 : vector<8xf32> to vector<8x1xf32>
    %64 = arith.maximumf %61, %63 : vector<8x1xf32>
    %65 = arith.subf %61, %64 : vector<8x1xf32>
    %66 = math.exp %65 : vector<8x1xf32>
    %67 = vector.broadcast %64 : vector<8x1xf32> to vector<8x8xf32>
    %68 = arith.subf %59, %67 : vector<8x8xf32>
    %69 = math.exp %68 : vector<8x8xf32>
    %c1_42 = arith.constant 1 : index
    %c0_43 = arith.constant 0 : index
    %c0_44 = arith.constant 0 : index
    %70 = vector.load %arg17[%c1_42, %c0_43, %c0_44] : memref<4x8x1xf32, #tpu.memory_space<vmem>>, vector<1x8x1xf32>
    %71 = vector.shape_cast %70 : vector<1x8x1xf32> to vector<8x1xf32>
    %72 = arith.mulf %66, %71 : vector<8x1xf32>
    %cst_45 = arith.constant dense<0.000000e+00> : vector<8xf32>
    %73 = vector.multi_reduction <add>, %69, %cst_45 [1] : vector<8x8xf32> to vector<8xf32>
    %74 = vector.shape_cast %73 : vector<8xf32> to vector<8x1xf32>
    %75 = arith.addf %72, %74 : vector<8x1xf32>
    %c1_46 = arith.constant 1 : index
    %c0_47 = arith.constant 0 : index
    %c0_48 = arith.constant 0 : index
    %76 = vector.load %arg17[%c1_46, %c0_47, %c0_48] : memref<4x8x1xf32, #tpu.memory_space<vmem>>, vector<1x8x1xf32>
    %77 = vector.shape_cast %76 : vector<1x8x1xf32> to vector<8x1xf32>
    %78 = vector.shape_cast %75 : vector<8x1xf32> to vector<1x8x1xf32>
    tpu.vector_store %arg17[%c1_46, %c0_47, %c0_48], %78 {strides = array<i32>} : memref<4x8x1xf32, #tpu.memory_space<vmem>>, vector<1x8x1xf32>,
    %c0_49 = arith.constant 0 : index
    %c8_50 = arith.constant 8 : index
    %79 = vector.load %arg18[%c0_49, %c8_50] : memref<8x32xf32, #tpu.memory_space<vmem>>, vector<8x8xf32>
    %80 = vector.broadcast %66 : vector<8x1xf32> to vector<8x8xf32>
    %81 = arith.mulf %80, %79 : vector<8x8xf32>
    %82 = arith.truncf %69 : vector<8x8xf32> to vector<8x8xbf16>
    %cst_51 = arith.constant dense<0.000000e+00> : vector<8x8xf32>
    %83 = tpu.matmul %82, %58, %cst_51 {dimension_numbers = #tpu.dot_dimension_numbers<[1], [0], [0], [1], [0, 0, 1, 1], [], []>} : vector<8x8xbf16>, vector<8x8xbf16>, vector<8x8xf32> -> vector<8x8xf32>
    %84 = arith.addf %81, %83 : vector<8x8xf32>
    %c0_52 = arith.constant 0 : index
    %c8_53 = arith.constant 8 : index
    %85 = vector.load %arg18[%c0_52, %c8_53] : memref<8x32xf32, #tpu.memory_space<vmem>>, vector<8x8xf32>
    tpu.vector_store %arg18[%c0_52, %c8_53], %84 {strides = array<i32>} : memref<8x32xf32, #tpu.memory_space<vmem>>, vector<8x8xf32>,
    %c1_54 = arith.constant 1 : index
    %c0_55 = arith.constant 0 : index
    %c0_56 = arith.constant 0 : index
    %86 = vector.load %arg16[%c1_54, %c0_55, %c0_56] : memref<4x8x1xf32, #tpu.memory_space<vmem>>, vector<1x8x1xf32>
    %87 = vector.shape_cast %86 : vector<1x8x1xf32> to vector<8x1xf32>
    %88 = vector.shape_cast %64 : vector<8x1xf32> to vector<1x8x1xf32>
    tpu.vector_store %arg16[%c1_54, %c0_55, %c0_56], %88 {strides = array<i32>} : memref<4x8x1xf32, #tpu.memory_space<vmem>>, vector<1x8x1xf32>,
    %c0_57 = arith.constant 0 : index
    %c16 = arith.constant 16 : index
    %89 = vector.load %arg15[%c0_57, %c16] : memref<8x32xbf16, #tpu.memory_space<vmem>>, vector<8x8xbf16>
    %90 = vector.extract_strided_slice %12 {offsets = [0, 16], sizes = [8, 8], strides = [1, 1]} : vector<8x32xbf16> to vector<8x8xbf16>
    %91 = vector.extract_strided_slice %22 {offsets = [0, 16], sizes = [8, 8], strides = [1, 1]} : vector<8x32xbf16> to vector<8x8xbf16>
    %cst_58 = arith.constant dense<0.000000e+00> : vector<8x8xf32>
    %92 = tpu.matmul %89, %90, %cst_58 {dimension_numbers = #tpu.dot_dimension_numbers<[1], [1], [0], [0], [0, 0, 1, 0], [], []>} : vector<8x8xbf16>, vector<8x8xbf16>, vector<8x8xf32> -> vector<8x8xf32>
    %c2 = arith.constant 2 : index
    %c0_59 = arith.constant 0 : index
    %c0_60 = arith.constant 0 : index
    %93 = vector.load %arg16[%c2, %c0_59, %c0_60] : memref<4x8x1xf32, #tpu.memory_space<vmem>>, vector<1x8x1xf32>
    %94 = vector.shape_cast %93 : vector<1x8x1xf32> to vector<8x1xf32>
    %cst_61 = arith.constant dense<0xFF800000> : vector<8xf32>
    %95 = vector.multi_reduction <maximumf>, %92, %cst_61 [1] : vector<8x8xf32> to vector<8xf32>
    %96 = vector.shape_cast %95 : vector<8xf32> to vector<8x1xf32>
    %97 = arith.maximumf %94, %96 : vector<8x1xf32>
    %98 = arith.subf %94, %97 : vector<8x1xf32>
    %99 = math.exp %98 : vector<8x1xf32>
    %100 = vector.broadcast %97 : vector<8x1xf32> to vector<8x8xf32>
    %101 = arith.subf %92, %100 : vector<8x8xf32>
    %102 = math.exp %101 : vector<8x8xf32>
    %c2_62 = arith.constant 2 : index
    %c0_63 = arith.constant 0 : index
    %c0_64 = arith.constant 0 : index
    %103 = vector.load %arg17[%c2_62, %c0_63, %c0_64] : memref<4x8x1xf32, #tpu.memory_space<vmem>>, vector<1x8x1xf32>
    %104 = vector.shape_cast %103 : vector<1x8x1xf32> to vector<8x1xf32>
    %105 = arith.mulf %99, %104 : vector<8x1xf32>
    %cst_65 = arith.constant dense<0.000000e+00> : vector<8xf32>
    %106 = vector.multi_reduction <add>, %102, %cst_65 [1] : vector<8x8xf32> to vector<8xf32>
    %107 = vector.shape_cast %106 : vector<8xf32> to vector<8x1xf32>
    %108 = arith.addf %105, %107 : vector<8x1xf32>
    %c2_66 = arith.constant 2 : index
    %c0_67 = arith.constant 0 : index
    %c0_68 = arith.constant 0 : index
    %109 = vector.load %arg17[%c2_66, %c0_67, %c0_68] : memref<4x8x1xf32, #tpu.memory_space<vmem>>, vector<1x8x1xf32>
    %110 = vector.shape_cast %109 : vector<1x8x1xf32> to vector<8x1xf32>
    %111 = vector.shape_cast %108 : vector<8x1xf32> to vector<1x8x1xf32>
    tpu.vector_store %arg17[%c2_66, %c0_67, %c0_68], %111 {strides = array<i32>} : memref<4x8x1xf32, #tpu.memory_space<vmem>>, vector<1x8x1xf32>,
    %c0_69 = arith.constant 0 : index
    %c16_70 = arith.constant 16 : index
    %112 = vector.load %arg18[%c0_69, %c16_70] : memref<8x32xf32, #tpu.memory_space<vmem>>, vector<8x8xf32>
    %113 = vector.broadcast %99 : vector<8x1xf32> to vector<8x8xf32>
    %114 = arith.mulf %113, %112 : vector<8x8xf32>
    %115 = arith.truncf %102 : vector<8x8xf32> to vector<8x8xbf16>
    %cst_71 = arith.constant dense<0.000000e+00> : vector<8x8xf32>
    %116 = tpu.matmul %115, %91, %cst_71 {dimension_numbers = #tpu.dot_dimension_numbers<[1], [0], [0], [1], [0, 0, 1, 1], [], []>} : vector<8x8xbf16>, vector<8x8xbf16>, vector<8x8xf32> -> vector<8x8xf32>
    %117 = arith.addf %114, %116 : vector<8x8xf32>
    %c0_72 = arith.constant 0 : index
    %c16_73 = arith.constant 16 : index
    %118 = vector.load %arg18[%c0_72, %c16_73] : memref<8x32xf32, #tpu.memory_space<vmem>>, vector<8x8xf32>
    tpu.vector_store %arg18[%c0_72, %c16_73], %117 {strides = array<i32>} : memref<8x32xf32, #tpu.memory_space<vmem>>, vector<8x8xf32>,
    %c2_74 = arith.constant 2 : index
    %c0_75 = arith.constant 0 : index
    %c0_76 = arith.constant 0 : index
    %119 = vector.load %arg16[%c2_74, %c0_75, %c0_76] : memref<4x8x1xf32, #tpu.memory_space<vmem>>, vector<1x8x1xf32>
    %120 = vector.shape_cast %119 : vector<1x8x1xf32> to vector<8x1xf32>
    %121 = vector.shape_cast %97 : vector<8x1xf32> to vector<1x8x1xf32>
    tpu.vector_store %arg16[%c2_74, %c0_75, %c0_76], %121 {strides = array<i32>} : memref<4x8x1xf32, #tpu.memory_space<vmem>>, vector<1x8x1xf32>,
    %c0_77 = arith.constant 0 : index
    %c24 = arith.constant 24 : index
    %122 = vector.load %arg15[%c0_77, %c24] : memref<8x32xbf16, #tpu.memory_space<vmem>>, vector<8x8xbf16>
    %123 = vector.extract_strided_slice %12 {offsets = [0, 24], sizes = [8, 8], strides = [1, 1]} : vector<8x32xbf16> to vector<8x8xbf16>
    %124 = vector.extract_strided_slice %22 {offsets = [0, 24], sizes = [8, 8], strides = [1, 1]} : vector<8x32xbf16> to vector<8x8xbf16>
    %cst_78 = arith.constant dense<0.000000e+00> : vector<8x8xf32>
    %125 = tpu.matmul %122, %123, %cst_78 {dimension_numbers = #tpu.dot_dimension_numbers<[1], [1], [0], [0], [0, 0, 1, 0], [], []>} : vector<8x8xbf16>, vector<8x8xbf16>, vector<8x8xf32> -> vector<8x8xf32>
    %c3 = arith.constant 3 : index
    %c0_79 = arith.constant 0 : index
    %c0_80 = arith.constant 0 : index
    %126 = vector.load %arg16[%c3, %c0_79, %c0_80] : memref<4x8x1xf32, #tpu.memory_space<vmem>>, vector<1x8x1xf32>
    %127 = vector.shape_cast %126 : vector<1x8x1xf32> to vector<8x1xf32>
    %cst_81 = arith.constant dense<0xFF800000> : vector<8xf32>
    %128 = vector.multi_reduction <maximumf>, %125, %cst_81 [1] : vector<8x8xf32> to vector<8xf32>
    %129 = vector.shape_cast %128 : vector<8xf32> to vector<8x1xf32>
    %130 = arith.maximumf %127, %129 : vector<8x1xf32>
    %131 = arith.subf %127, %130 : vector<8x1xf32>
    %132 = math.exp %131 : vector<8x1xf32>
    %133 = vector.broadcast %130 : vector<8x1xf32> to vector<8x8xf32>
    %134 = arith.subf %125, %133 : vector<8x8xf32>
    %135 = math.exp %134 : vector<8x8xf32>
    %c3_82 = arith.constant 3 : index
    %c0_83 = arith.constant 0 : index
    %c0_84 = arith.constant 0 : index
    %136 = vector.load %arg17[%c3_82, %c0_83, %c0_84] : memref<4x8x1xf32, #tpu.memory_space<vmem>>, vector<1x8x1xf32>
    %137 = vector.shape_cast %136 : vector<1x8x1xf32> to vector<8x1xf32>
    %138 = arith.mulf %132, %137 : vector<8x1xf32>
    %cst_85 = arith.constant dense<0.000000e+00> : vector<8xf32>
    %139 = vector.multi_reduction <add>, %135, %cst_85 [1] : vector<8x8xf32> to vector<8xf32>
    %140 = vector.shape_cast %139 : vector<8xf32> to vector<8x1xf32>
    %141 = arith.addf %138, %140 : vector<8x1xf32>
    %c3_86 = arith.constant 3 : index
    %c0_87 = arith.constant 0 : index
    %c0_88 = arith.constant 0 : index
    %142 = vector.load %arg17[%c3_86, %c0_87, %c0_88] : memref<4x8x1xf32, #tpu.memory_space<vmem>>, vector<1x8x1xf32>
    %143 = vector.shape_cast %142 : vector<1x8x1xf32> to vector<8x1xf32>
    %144 = vector.shape_cast %141 : vector<8x1xf32> to vector<1x8x1xf32>
    tpu.vector_store %arg17[%c3_86, %c0_87, %c0_88], %144 {strides = array<i32>} : memref<4x8x1xf32, #tpu.memory_space<vmem>>, vector<1x8x1xf32>,
    %c0_89 = arith.constant 0 : index
    %c24_90 = arith.constant 24 : index
    %145 = vector.load %arg18[%c0_89, %c24_90] : memref<8x32xf32, #tpu.memory_space<vmem>>, vector<8x8xf32>
    %146 = vector.broadcast %132 : vector<8x1xf32> to vector<8x8xf32>
    %147 = arith.mulf %146, %145 : vector<8x8xf32>
    %148 = arith.truncf %135 : vector<8x8xf32> to vector<8x8xbf16>
    %cst_91 = arith.constant dense<0.000000e+00> : vector<8x8xf32>
    %149 = tpu.matmul %148, %124, %cst_91 {dimension_numbers = #tpu.dot_dimension_numbers<[1], [0], [0], [1], [0, 0, 1, 1], [], []>} : vector<8x8xbf16>, vector<8x8xbf16>, vector<8x8xf32> -> vector<8x8xf32>
    %150 = arith.addf %147, %149 : vector<8x8xf32>
    %c0_92 = arith.constant 0 : index
    %c24_93 = arith.constant 24 : index
    %151 = vector.load %arg18[%c0_92, %c24_93] : memref<8x32xf32, #tpu.memory_space<vmem>>, vector<8x8xf32>
    tpu.vector_store %arg18[%c0_92, %c24_93], %150 {strides = array<i32>} : memref<8x32xf32, #tpu.memory_space<vmem>>, vector<8x8xf32>,
    %c3_94 = arith.constant 3 : index
    %c0_95 = arith.constant 0 : index
    %c0_96 = arith.constant 0 : index
    %152 = vector.load %arg16[%c3_94, %c0_95, %c0_96] : memref<4x8x1xf32, #tpu.memory_space<vmem>>, vector<1x8x1xf32>
    %153 = vector.shape_cast %152 : vector<1x8x1xf32> to vector<8x1xf32>
    %154 = vector.shape_cast %130 : vector<8x1xf32> to vector<1x8x1xf32>
    tpu.vector_store %arg16[%c3_94, %c0_95, %c0_96], %154 {strides = array<i32>} : memref<4x8x1xf32, #tpu.memory_space<vmem>>, vector<1x8x1xf32>,
    %c0_i32_97 = arith.constant 0 : i32
    %155 = arith.cmpi eq, %arg2, %c0_i32_97 : i32
    %156 = arith.extui %155 : i1 to i32
    %c0_i32_98 = arith.constant 0 : i32
    %157 = arith.cmpi ne, %156, %c0_i32_98 : i32
    scf.if %157 {
      %c0_99 = arith.constant 0 : index
      %c0_100 = arith.constant 0 : index
      %158 = vector.load %arg18[%c0_99, %c0_100] : memref<8x32xf32, #tpu.memory_space<vmem>>, vector<8x8xf32>
      %c0_101 = arith.constant 0 : index
      %c0_102 = arith.constant 0 : index
      %c0_103 = arith.constant 0 : index
      %159 = vector.load %arg17[%c0_101, %c0_102, %c0_103] : memref<4x8x1xf32, #tpu.memory_space<vmem>>, vector<1x8x1xf32>
      %160 = vector.shape_cast %159 : vector<1x8x1xf32> to vector<8x1xf32>
      %161 = tpu.reciprocal %160 {approx = true} : vector<8x1xf32> -> vector<8x1xf32>
      %162 = vector.broadcast %161 : vector<8x1xf32> to vector<8x8xf32>
      %163 = arith.mulf %158, %162 : vector<8x8xf32>
      %c0_104 = arith.constant 0 : index
      %c0_105 = arith.constant 0 : index
      %164 = vector.load %arg18[%c0_104, %c0_105] : memref<8x32xf32, #tpu.memory_space<vmem>>, vector<8x8xf32>
      tpu.vector_store %arg18[%c0_104, %c0_105], %163 {strides = array<i32>} : memref<8x32xf32, #tpu.memory_space<vmem>>, vector<8x8xf32>,
      %c0_106 = arith.constant 0 : index
      %c8_107 = arith.constant 8 : index
      %165 = vector.load %arg18[%c0_106, %c8_107] : memref<8x32xf32, #tpu.memory_space<vmem>>, vector<8x8xf32>
      %c1_108 = arith.constant 1 : index
      %c0_109 = arith.constant 0 : index
      %c0_110 = arith.constant 0 : index
      %166 = vector.load %arg17[%c1_108, %c0_109, %c0_110] : memref<4x8x1xf32, #tpu.memory_space<vmem>>, vector<1x8x1xf32>
      %167 = vector.shape_cast %166 : vector<1x8x1xf32> to vector<8x1xf32>
      %168 = tpu.reciprocal %167 {approx = true} : vector<8x1xf32> -> vector<8x1xf32>
      %169 = vector.broadcast %168 : vector<8x1xf32> to vector<8x8xf32>
      %170 = arith.mulf %165, %169 : vector<8x8xf32>
      %c0_111 = arith.constant 0 : index
      %c8_112 = arith.constant 8 : index
      %171 = vector.load %arg18[%c0_111, %c8_112] : memref<8x32xf32, #tpu.memory_space<vmem>>, vector<8x8xf32>
      tpu.vector_store %arg18[%c0_111, %c8_112], %170 {strides = array<i32>} : memref<8x32xf32, #tpu.memory_space<vmem>>, vector<8x8xf32>,
      %c0_113 = arith.constant 0 : index
      %c16_114 = arith.constant 16 : index
      %172 = vector.load %arg18[%c0_113, %c16_114] : memref<8x32xf32, #tpu.memory_space<vmem>>, vector<8x8xf32>
      %c2_115 = arith.constant 2 : index
      %c0_116 = arith.constant 0 : index
      %c0_117 = arith.constant 0 : index
      %173 = vector.load %arg17[%c2_115, %c0_116, %c0_117] : memref<4x8x1xf32, #tpu.memory_space<vmem>>, vector<1x8x1xf32>
      %174 = vector.shape_cast %173 : vector<1x8x1xf32> to vector<8x1xf32>
      %175 = tpu.reciprocal %174 {approx = true} : vector<8x1xf32> -> vector<8x1xf32>
      %176 = vector.broadcast %175 : vector<8x1xf32> to vector<8x8xf32>
      %177 = arith.mulf %172, %176 : vector<8x8xf32>
      %c0_118 = arith.constant 0 : index
      %c16_119 = arith.constant 16 : index
      %178 = vector.load %arg18[%c0_118, %c16_119] : memref<8x32xf32, #tpu.memory_space<vmem>>, vector<8x8xf32>
      tpu.vector_store %arg18[%c0_118, %c16_119], %177 {strides = array<i32>} : memref<8x32xf32, #tpu.memory_space<vmem>>, vector<8x8xf32>,
      %c0_120 = arith.constant 0 : index
      %c24_121 = arith.constant 24 : index
      %179 = vector.load %arg18[%c0_120, %c24_121] : memref<8x32xf32, #tpu.memory_space<vmem>>, vector<8x8xf32>
      %c3_122 = arith.constant 3 : index
      %c0_123 = arith.constant 0 : index
      %c0_124 = arith.constant 0 : index
      %180 = vector.load %arg17[%c3_122, %c0_123, %c0_124] : memref<4x8x1xf32, #tpu.memory_space<vmem>>, vector<1x8x1xf32>
      %181 = vector.shape_cast %180 : vector<1x8x1xf32> to vector<8x1xf32>
      %182 = tpu.reciprocal %181 {approx = true} : vector<8x1xf32> -> vector<8x1xf32>
      %183 = vector.broadcast %182 : vector<8x1xf32> to vector<8x8xf32>
      %184 = arith.mulf %179, %183 : vector<8x8xf32>
      %c0_125 = arith.constant 0 : index
      %c24_126 = arith.constant 24 : index
      %185 = vector.load %arg18[%c0_125, %c24_126] : memref<8x32xf32, #tpu.memory_space<vmem>>, vector<8x8xf32>
      tpu.vector_store %arg18[%c0_125, %c24_126], %184 {strides = array<i32>} : memref<8x32xf32, #tpu.memory_space<vmem>>, vector<8x8xf32>,
      %c0_127 = arith.constant 0 : index
      %c0_128 = arith.constant 0 : index
      %186 = vector.load %arg18[%c0_127, %c0_128] : memref<8x32xf32, #tpu.memory_space<vmem>>, vector<8x32xf32>
      %187 = arith.truncf %186 : vector<8x32xf32> to vector<8x32xbf16>
      %c0_129 = arith.constant 0 : index
      %c0_130 = arith.constant 0 : index
      %188 = vector.load %arg12[%c0_129, %c0_130] : memref<32x32xf32, #tpu.memory_space<vmem>>, vector<32x32xf32>
      %189 = arith.truncf %188 : vector<32x32xf32> to vector<32x32xbf16>
      %cst_131 = arith.constant dense<0.000000e+00> : vector<8x32xf32>
      %190 = tpu.matmul %187, %189, %cst_131 {dimension_numbers = #tpu.dot_dimension_numbers<[1], [0], [0], [1], [0, 0, 1, 1], [], []>} : vector<8x32xbf16>, vector<32x32xbf16>, vector<8x32xf32> -> vector<8x32xf32>
      %c0_132 = arith.constant 0 : index
      %c0_133 = arith.constant 0 : index
      %191 = vector.load %arg13[%c0_132, %c0_133] : memref<1x32xf32, #tpu.memory_space<vmem>>, vector<1x32xf32>
      %192 = vector.broadcast %191 : vector<1x32xf32> to vector<8x32xf32>
      %193 = arith.addf %190, %192 : vector<8x32xf32>
      %c0_134 = arith.constant 0 : index
      %c0_135 = arith.constant 0 : index
      %c0_136 = arith.constant 0 : index
      %194 = vector.load %arg14[%c0_134, %c0_135, %c0_136] : memref<1x8x32xf32, #tpu.memory_space<vmem>>, vector<1x8x32xf32>
      %195 = vector.shape_cast %194 : vector<1x8x32xf32> to vector<8x32xf32>
      %196 = vector.shape_cast %193 : vector<8x32xf32> to vector<1x8x32xf32>
      tpu.vector_store %arg14[%c0_134, %c0_135, %c0_136], %196 {strides = array<i32>} : memref<1x8x32xf32, #tpu.memory_space<vmem>>, vector<1x8x32xf32>,
    } else {
    }
    return
  }
  func.func @transform_0(%arg0: i32, %arg1: i32, %arg2: i32) -> (i32, i32, i32) {
    %c0_i32 = arith.constant 0 : i32
    %c0_i32_0 = arith.constant 0 : i32
    return %arg0, %arg1, %c0_i32 : i32, i32, i32
  }
  func.func @transform_1(%arg0: i32, %arg1: i32, %arg2: i32) -> (i32, i32, i32) {
    %c0_i32 = arith.constant 0 : i32
    %c0_i32_0 = arith.constant 0 : i32
    return %arg0, %arg2, %c0_i32 : i32, i32, i32
  }
  func.func @transform_2(%arg0: i32, %arg1: i32, %arg2: i32) -> (i32, i32, i32) {
    %c0_i32 = arith.constant 0 : i32
    %c0_i32_0 = arith.constant 0 : i32
    return %arg0, %arg2, %c0_i32 : i32, i32, i32
  }
  func.func @transform_3(%arg0: i32, %arg1: i32, %arg2: i32) -> (i32, i32) {
    %c0_i32 = arith.constant 0 : i32
    %c0_i32_0 = arith.constant 0 : i32
    %c0_i32_1 = arith.constant 0 : i32
    return %c0_i32, %c0_i32_0 : i32, i32
  }
  func.func @transform_4(%arg0: i32, %arg1: i32, %arg2: i32) -> (i32, i32) {
    %c0_i32 = arith.constant 0 : i32
    %c0_i32_0 = arith.constant 0 : i32
    %c0_i32_1 = arith.constant 0 : i32
    return %c0_i32, %c0_i32_0 : i32, i32
  }
  func.func @transform_5(%arg0: i32, %arg1: i32, %arg2: i32) -> (i32, i32) {
    %c0_i32 = arith.constant 0 : i32
    %c0_i32_0 = arith.constant 0 : i32
    %c0_i32_1 = arith.constant 0 : i32
    return %c0_i32, %c0_i32_0 : i32, i32
  }
  func.func @transform_6(%arg0: i32, %arg1: i32, %arg2: i32) -> (i32, i32) {
    %c0_i32 = arith.constant 0 : i32
    %c0_i32_0 = arith.constant 0 : i32
    %c0_i32_1 = arith.constant 0 : i32
    return %c0_i32, %c0_i32_0 : i32, i32
  }
  func.func @transform_7(%arg0: i32, %arg1: i32, %arg2: i32) -> (i32, i32) {
    %c0_i32 = arith.constant 0 : i32
    %c0_i32_0 = arith.constant 0 : i32
    %c0_i32_1 = arith.constant 0 : i32
    return %c0_i32, %c0_i32_0 : i32, i32
  }
  func.func @transform_8(%arg0: i32, %arg1: i32, %arg2: i32) -> (i32, i32) {
    %c0_i32 = arith.constant 0 : i32
    %c0_i32_0 = arith.constant 0 : i32
    %c0_i32_1 = arith.constant 0 : i32
    return %c0_i32, %c0_i32_0 : i32, i32
  }
  func.func @transform_9(%arg0: i32, %arg1: i32, %arg2: i32) -> (i32, i32) {
    %c0_i32 = arith.constant 0 : i32
    %c0_i32_0 = arith.constant 0 : i32
    %c0_i32_1 = arith.constant 0 : i32
    return %c0_i32, %c0_i32_0 : i32, i32
  }
  func.func @transform_10(%arg0: i32, %arg1: i32, %arg2: i32) -> (i32, i32) {
    %c0_i32 = arith.constant 0 : i32
    %c0_i32_0 = arith.constant 0 : i32
    %c0_i32_1 = arith.constant 0 : i32
    return %c0_i32, %c0_i32_0 : i32, i32
  }
  func.func @transform_11(%arg0: i32, %arg1: i32, %arg2: i32) -> (i32, i32, i32) {
    %c0_i32 = arith.constant 0 : i32
    %c0_i32_0 = arith.constant 0 : i32
    return %arg0, %arg1, %c0_i32 : i32, i32, i32
  }
}

</mosaic_0001>

<bundles_post_ra>
// kernel: tpu_custom_call.1
= control target key start
LH: loop header
LB: loop body
LE: loop exit
PB: predicated region body
PF: predicated region fallthrough
CT: control target
= control target key end

     0   :  { %s3168_s0 = inlined_call_operand.hbm [shape: f32[2,8,32], index: 0, kind: input, shape index: {}]   ;;  %s3169_s1 = inlined_call_operand.hbm [shape: f32[2,8,32], index: 1, kind: input, shape index: {}]   ;;  %s3170_s2 = inlined_call_operand.hbm [shape: f32[2,8,32], index: 2, kind: input, shape index: {}]   ;;  %s3171_s3 = inlined_call_operand.hbm [shape: f32[32,32], index: 3, kind: input, shape index: {}]   ;;  %s3172_s4 = inlined_call_operand.hbm [shape: f32[1,32], index: 4, kind: input, shape index: {}]   ;;  %s3173_s5 = inlined_call_operand.hbm [shape: f32[32,32], index: 5, kind: input, shape index: {}]   ;;  %s3174_s6 = inlined_call_operand.hbm [shape: f32[1,32], index: 6, kind: input, shape index: {}]   ;;  %s3175_s7 = inlined_call_operand.hbm [shape: f32[32,32], index: 7, kind: input, shape index: {}]   ;;  %s3176_s8 = inlined_call_operand.hbm [shape: f32[1,32], index: 8, kind: input, shape index: {}]   ;;  %s3177_s9 = inlined_call_operand.hbm [shape: f32[32,32], index: 9, kind: input, shape index: {}]   ;;  %s3178_s10 = inlined_call_operand.hbm [shape: f32[1,32], index: 10, kind: input, shape index: {}]   ;;  %s3179_s11 = inlined_call_operand.hbm [shape: f32[2,8,32], index: 11, kind: output, shape index: {}]  }
   0x1   :  { %3201 = sst [smem:[#allocation38_spill]] %s3168_s0 }
   0x2   :  { %3202 = sst [smem:[#allocation39_spill]] %s3169_s1 }
   0x3   :  { %3203 = sst [smem:[#allocation40_spill]] %s3170_s2 }
   0x4   :  { %3204 = sst [smem:[#allocation41_spill]] %s3171_s3 }
   0x5   :  { %3205 = sst [smem:[#allocation42_spill]] %s3173_s5 }
   0x6   :  { %3206 = sst [smem:[#allocation43_spill]] %s3175_s7 }
   0x7   :  { %3207 = sst [smem:[#allocation44_spill]] %s3177_s9 }
   0x8   :  { %3208 = sst [smem:[#allocation45_spill]] %s3179_s11 }
   0x9   :  { %16 = vsyncpa [#allocation7], 0 }
   0xa   :  { %18 = vsyncpa [#allocation7 + $0x1], 0 }
   0xb   :  { %19 = vsyncpa [#allocation10], 0 }
   0xc   :  { %21 = vsyncpa [#allocation10 + $0x1], 0 }
   0xd   :  { %22 = vsyncpa [#allocation13], 0 }
   0xe   :  { %23 = vsyncpa [#allocation16], 0 }
   0xf   :  { %24 = vsyncpa [#allocation19], 0 }
  0x10   :  { %25 = vsyncpa [#allocation22], 0 }
  0x11   :  { %26 = vsyncpa [#allocation8], 0 }
  0x12   :  { %28 = vsyncpa [#allocation8 + $0x1], 0  ;;  %s2548_s17 = smov 0   ;;  %s2550_s18 = smov 0  }
  0x13   :  { %s2552_s19 = smov 0   ;;  %s2554_s20 = smov 0  }
  0x14   :  { %s2556_s21 = smov 0   ;;  %s2558_s22 = smov 0  }
  0x15 LB: > { %3209 = sst [smem:[#allocation32_spill]] %s2454_s20  ;;  %s2579_s23 = sadd.s32 4294967295, %s2462_s22   ;;  %s2462_s22 = sphi %s2558_s22, %s34_s22   ;;  %s2458_s21 = sphi %s2556_s21, %s3258_s21   ;;  %s2454_s20 = sphi %s2554_s20, %s3262_s20   ;;  %s2450_s19 = sphi %s2552_s19, %s3261_s19   ;;  %s2446_s18 = sphi %s2550_s18, %s3260_s18   ;;  %s2442_s17 = sphi %s2548_s17, %s3259_s17  }
  0x16   : > { %3210 = sst [smem:[#allocation33_spill]] %s2458_s21  ;;  %p1692_p0 = scmp.ge.s32.totalorder %s2462_s22, 1 }
  0x17   : > { %3211 = sst [smem:[#allocation34_spill]] %s2462_s22  ;;  %p3184_p1 = scmp.eq.s32.totalorder %s2579_s23, 0 }
  0x18   : > { %p338_p2 = scmp.lt.s32.totalorder %s2462_s22, 3  ;;  %s2464_s25 = smov [#allocation12]  }
  0x19   : > { %s350_s26 = sshll.u32 %s2464_s25, 4  ;;  %s2465_s28 = smov [#allocation15]   ;;  %s2588_s26 = int_to_ptr.vmem [resolvable:$true] %s350_s26 }
  0x1a   : > { %p2584_p3 = pnand %p1692_p0, %p338_p2  ;;  %s374_s29 = sshll.u32 %s2465_s28, 4  ;;  %s2599_s29 = int_to_ptr.vmem [resolvable:$true] %s374_s29 }
  0x1b   : > { %s2466_s30 = smov [#allocation18]   ;;  %s3215_s3 = sld [smem:[#allocation41_spill]] }
  0x1c   : > { %s3212_s24 = scalar_select %p2584_p3, 1, 0 }
  0x1d   : > { %p1892_p4 = pneg %p2584_p3  ;;  %s2601_s12 = sshll.u32 %s2466_s30, 4  ;;  %s399_s12 = int_to_ptr.vmem [resolvable:$true] %s2601_s12 }
  0x1e   : > { %3213 = sst [smem:[#allocation35_spill]] %s3212_s24 }
  0x1f   : > { %p2595_p6 = pnand %p1892_p4, %p3184_p1 }
  0x21   : > { %s3214_s27 = scalar_select %p2595_p6, 1, 0 }
  0x22   : > { %s2046_s15 = scalar_lea.hbm %s3215_s3, 512  ;;  %p2611_p8 = pneg %p2595_p6 }
  0x23   : > { %p2047_p7 = scmp.ne.s32.totalorder %s3215_s3, %s2046_s15  ;;  %p2053_p11 = scmp.lt.u32.totalorder %s2046_s15, %s3215_s3 }
  0x24   : > { %s3216_s11 = scalar_select %p2611_p8, 1, 0 }
  0x25   : > { %p2049_p9 = pnand %p2611_p8, %p2047_p7 }
  0x27   : > { %p2050_p10 = pneg %p2049_p9 }
  0x29   : > { %p2055_p12 = pnand %p2053_p11, %p2050_p10 }
  0x2b   : > { %2058 = shalt.err (!%p2055_p12)
}
  0x2c   : > { %s2059_s13 = scalar_lea.vmem %s2588_s26, 512  ;;  %p2067_p4 = scmp.lt.s32.totalorder %s2588_s26, %s2588_s26 }
  0x2d   : > { %p2060_p13 = scmp.ne.s32.totalorder %s2588_s26, %s2059_s13  ;;  %p2068_p5 = scmp.lt.s32.totalorder %s2059_s13, %s2059_s13 }
  0x2f   : > { %p2062_p0 = pnand %p2060_p13, %p2611_p8  ;;  %p2069_p7 = por %p2068_p5, %p2067_p4 }
  0x31   : > { %p2063_p2 = pneg %p2062_p0 }
  0x33   : > { %p2070_p9 = pnand %p2069_p7, %p2063_p2 }
  0x35   : > { %2073 = shalt.err (!%p2070_p9)
}
  0x36   : > { %s2467_s14 = smov 128   ;;  %s2468_s15 = smov 8  }
  0x37   : > { %1895 = dma.hbm_to_vmem [thread:$0]  (!%p2595_p6), %s3215_s3, 512, %s2588_s26, [#allocation13], %s2467_s14, %s2467_s14, %s2468_s15  }
  0x38   : > { %s3217_s5 = sld [smem:[#allocation42_spill]] }
  0x3e   : > { %s2074_s13 = scalar_lea.hbm %s3217_s5, 512 }
  0x3f   : > { %p2075_p5 = scmp.ne.s32.totalorder %s3217_s5, %s2074_s13  ;;  %p2081_p12 = scmp.lt.u32.totalorder %s2074_s13, %s3217_s5 }
  0x41   : > { %p2077_p10 = pnand %p2075_p5, %p2611_p8 }
  0x43   : > { %p2078_p11 = pneg %p2077_p10 }
  0x45   : > { %p2083_p13 = pnand %p2081_p12, %p2078_p11 }
  0x47   : > { %2086 = shalt.err (!%p2083_p13)
}
  0x48   : > { %s2087_s26 = scalar_lea.vmem %s2599_s29, 512  ;;  %p2095_p7 = scmp.lt.s32.totalorder %s2599_s29, %s2599_s29 }
  0x49   : > { %p2088_p0 = scmp.ne.s32.totalorder %s2599_s29, %s2087_s26  ;;  %p2096_p9 = scmp.lt.s32.totalorder %s2087_s26, %s2087_s26 }
  0x4b   : > { %p2090_p2 = pnand %p2088_p0, %p2611_p8  ;;  %p2097_p5 = por %p2096_p9, %p2095_p7 }
  0x4d   : > { %p2091_p4 = pneg %p2090_p2 }
  0x4f   : > { %p2098_p10 = pnand %p2097_p5, %p2091_p4 }
  0x51   : > { %2101 = shalt.err (!%p2098_p10)
}
  0x52   : > { %1901 = dma.hbm_to_vmem [thread:$0]  (!%p2595_p6), %s3217_s5, 512, %s2599_s29, [#allocation16], %s2467_s14, %s2467_s14, %s2468_s15  }
  0x53   : > { %s3218_s7 = sld [smem:[#allocation43_spill]] }
  0x59   : > { %s2102_s16 = scalar_lea.hbm %s3218_s7, 512 }
  0x5a   : > { %p2103_p11 = scmp.ne.s32.totalorder %s3218_s7, %s2102_s16  ;;  %p2109_p0 = scmp.lt.u32.totalorder %s2102_s16, %s3218_s7 }
  0x5c   : > { %p2105_p12 = pnand %p2103_p11, %p2611_p8 }
  0x5e   : > { %p2106_p13 = pneg %p2105_p12 }
  0x60   : > { %p2111_p2 = pnand %p2109_p0, %p2106_p13 }
  0x62   : > { %2114 = shalt.err (!%p2111_p2)
}
  0x63   : > { %s2115_s26 = scalar_lea.vmem %s399_s12, 512  ;;  %p2123_p5 = scmp.lt.s32.totalorder %s399_s12, %s399_s12 }
  0x64   : > { %p2116_p4 = scmp.ne.s32.totalorder %s399_s12, %s2115_s26  ;;  %p2124_p10 = scmp.lt.s32.totalorder %s2115_s26, %s2115_s26 }
  0x66   : > { %p2118_p7 = pnand %p2116_p4, %p2611_p8  ;;  %p2125_p1 = por %p2124_p10, %p2123_p5 }
  0x68   : > { %p2119_p9 = pneg %p2118_p7 }
  0x6a   : > { %p2126_p3 = pnand %p2125_p1, %p2119_p9 }
  0x6c   : > { %2129 = shalt.err (!%p2126_p3)
}
  0x6d   : > { %1907 = dma.hbm_to_vmem [thread:$0]  (!%p2595_p6), %s3218_s7, 512, %s399_s12, [#allocation19], %s2467_s14, %s2467_s14, %s2468_s15  }
  0x6e   : > { %s2469_s2 = smov [#allocation21]   ;;  %s3219_s9 = sld [smem:[#allocation44_spill]] }
  0x6f   : > { %s422_s20 = sshll.u32 %s2469_s2, 4  ;;  %s423_s20 = int_to_ptr.vmem [resolvable:$true] %s422_s20 }
  0x74   : > { %s2130_s25 = scalar_lea.hbm %s3219_s9, 512 }
  0x75   : > { %p2131_p1 = scmp.ne.s32.totalorder %s3219_s9, %s2130_s25  ;;  %p2137_p12 = scmp.lt.u32.totalorder %s2130_s25, %s3219_s9 }
  0x77   : > { %p2133_p3 = pnand %p2131_p1, %p2611_p8 }
  0x79   : > { %p2134_p11 = pneg %p2133_p3 }
  0x7b   : > { %p2139_p13 = pnand %p2137_p12, %p2134_p11 }
  0x7d   : > { %2142 = shalt.err (!%p2139_p13)
}
  0x7e   : > { %s2143_s12 = scalar_lea.vmem %s423_s20, 512  ;;  %p2151_p7 = scmp.lt.s32.totalorder %s423_s20, %s423_s20 }
  0x7f   : > { %p2144_p0 = scmp.ne.s32.totalorder %s423_s20, %s2143_s12  ;;  %p2152_p9 = scmp.lt.s32.totalorder %s2143_s12, %s2143_s12 }
  0x81   : > { %p2146_p2 = pnand %p2144_p0, %p2611_p8  ;;  %p2153_p5 = por %p2152_p9, %p2151_p7 }
  0x83   : > { %p2147_p4 = pneg %p2146_p2 }
  0x85   : > { %p2154_p10 = pnand %p2153_p5, %p2147_p4 }
  0x87   : > { %2157 = shalt.err (!%p2154_p10)
}
  0x88   : > { %1913 = dma.hbm_to_vmem [thread:$0]  (!%p2595_p6), %s3219_s9, 512, %s423_s20, [#allocation22], %s2467_s14, %s2467_s14, %s2468_s15  }
  0x89   : > { %s1691_s2 = sadd.s32 4294967294, %s2462_s22   ;;  %s53_s24 = sadd.s32 1, %s2458_s21 }
  0x8a   : > { %p55_p1 = scmp.ge.s32.totalorder %s53_s24, 2  ;;  %s62_s16 = sadd.s32 1, %s2450_s19 }
  0x8b   : > { %p69_p3 = scmp.ne.s32.totalorder %s2450_s19, %s2446_s18  ;;  %p70_p11 = scmp.eq.s32.totalorder %s2462_s22, 0 }
  0x8c   : > { %s3264_s24 = smov (%p55_p1, %s53_s24), 0  ;;  %p75_p13 = scmp.ne.s32.totalorder %s2446_s18, %s2442_s17 }
  0x8d   : > { %3220 = sst [smem:[#allocation36_spill]] %s3264_s24  ;;  %p2712_p12 = por %p70_p11, %p69_p3 }
  0x8e   : > { %s57_s14 = ssub.s32 %s2458_s21, %s3264_s24  ;;  %p325_p0 = scmp.eq.s32.totalorder %s2579_s23, 1 }
  0x8f   : > { %p60_p2 = scmp.eq.s32.totalorder %s57_s14, 0  ;;  %p3222_p4 = scmp.eq.s32.totalorder %s2579_s23, 0 }
  0x90   : > { %p2727_p9 = por %p325_p0, %p69_p3  ;;  %p331_p5 = scmp.eq.s32.totalorder %s1691_s2, 1 }
  0x91   : > { %p2723_p7 = por %p3222_p4, %p75_p13  ;;  %p1939_p1 = scmp.lt.s32.totalorder %s2462_s22, 2 }
  0x92   : > { %s3224_s20 = scalar_select %p2727_p9, 1, 0 }
  0x93   : > { %s3223_s15 = scalar_select %p2723_p7, 1, 0 }
  0x94   : > { %s2732_s28 = scalar_select %p60_p2, %s2450_s19, %s62_s16  }
  0x95   : > { %p2734_p10 = por %p331_p5, %p75_p13  ;;  %s3186_s13 = sand.u32 1, %s2450_s19  }
  0x96   : > { %3225 = sst [smem:[#allocation37_spill]] %s2732_s28  ;;  %s2741_s26 = sshll.u32 %s2458_s21, 7 }
  0x97   : > { %s3226_s30 = scalar_select %p2734_p10, 1, 0 }
  0x98   : > { %s2745_s12 = sshll.u32 %s3186_s13, 3  ;;  %p2749_p3 = pnand %p1939_p1, %p2712_p12 }
  0x99   : > { %s466_s0 = sand.u32 1, %s2462_s22   ;;  %s3228_s1 = sld [smem:[#allocation39_spill]] }
  0x9a   : > { %s3227_s29 = scalar_select %p2749_p3, 1, 0 }
  0x9b   : > { %s470_s3 = scalar_lea.vmem [#allocation9], %s2745_s12  ;;  %s2763_s25 = scalar_lea.sflag [#allocation10], %s466_s0 }
  0x9c   : > { %s478_s13 = sshll.u32 %s470_s3, 4  ;;  %p2769_p12 = pneg %p2749_p3  ;;  %s2761_s13 = int_to_ptr.vmem [resolvable:$true] %s478_s13 }
  0x9e   : > { %s3229_s7 = scalar_select %p2769_p12, 1, 0 }
  0x9f   : > { %s2758_s14 = scalar_lea.hbm %s3228_s1, %s2741_s26  ;;  %s2163_s9 = scalar_lea.hbm %s3228_s1, 256 }
  0xa0   : > { %s2158_s5 = scalar_lea.hbm %s2758_s14, 128  ;;  %p2164_p2 = scmp.lt.u32.totalorder %s2758_s14, %s3228_s1 }
  0xa1   : > { %p2159_p11 = scmp.ne.s32.totalorder %s2758_s14, %s2158_s5  ;;  %p2165_p4 = scmp.lt.u32.totalorder %s2163_s9, %s2158_s5 }
  0xa2   : > { %p2167_p1 = scmp.lt.u32.totalorder %s2158_s5, %s2758_s14 }
  0xa3   : > { %p2161_p13 = pnand %p2769_p12, %p2159_p11  ;;  %p2166_p5 = por %p2165_p4, %p2164_p2 }
  0xa5   : > { %p2162_p0 = pneg %p2161_p13  ;;  %p2168_p10 = por %p2167_p1, %p2166_p5 }
  0xa7   : > { %p2169_p9 = pnand %p2168_p10, %p2162_p0 }
  0xa9   : > { %2172 = shalt.err (!%p2169_p9)
}
  0xaa   : > { %s2173_s0 = scalar_lea.vmem %s2761_s13, 128  ;;  %s2470_s2 = smov [#allocation9]  }
  0xab   : > { %p2174_p11 = scmp.ne.s32.totalorder %s2761_s13, %s2173_s0  ;;  %s2178_s16 = sshll.u32 %s2470_s2, 4  ;;  %s2179_s16 = int_to_ptr.vmem [resolvable:$false] %s2178_s16 }
  0xac   : > { %s2180_s24 = scalar_lea.vmem %s2179_s16, 256  ;;  %p2181_p6 = scmp.lt.s32.totalorder %s2761_s13, %s2179_s16 }
  0xad   : > { %p2176_p13 = pnand %p2174_p11, %p2769_p12  ;;  %p2182_p8 = scmp.lt.s32.totalorder %s2180_s24, %s2173_s0 }
  0xaf   : > { %p2177_p7 = pneg %p2176_p13  ;;  %p2183_p2 = por %p2182_p8, %p2181_p6 }
  0xb1   : > { %p2184_p4 = pnand %p2183_p2, %p2177_p7 }
  0xb3   : > { %2187 = shalt.err (!%p2184_p4)
}
  0xb4   : > { %1923 = dma.hbm_to_vmem [thread:$0]  (!%p2749_p3), %s2758_s14, 128, %s2761_s13, %s2763_s25  }
  0xb5   : > { %s2471_s5 = smov [#allocation14]   ;;  %s2472_s3 = smov [#allocation17]  }
  0xb6   : > { %s364_s9 = sshll.u32 %s2471_s5, 4  ;;  %s388_s1 = sshll.u32 %s2472_s3, 4  ;;  %s365_s9 = int_to_ptr.vmem [resolvable:$true] %s364_s9  ;;  %s389_s1 = int_to_ptr.vmem [resolvable:$true] %s388_s1 }
  0xb7   : > { %s2188_s16 = scalar_lea.hbm %s3172_s4, 16  ;;  %p3230_p8 = scmp.ne.s32.totalorder %s3216_s11, 0 }
  0xb8   : > { %p2189_p6 = scmp.ne.s32.totalorder %s3172_s4, %s2188_s16  ;;  %p2195_p10 = scmp.lt.u32.totalorder %s2188_s16, %s3172_s4 }
  0xba   : > { %p2191_p7 = pnand %p2189_p6, %p3230_p8 }
  0xbc   : > { %p2192_p9 = pneg %p2191_p7 }
  0xbe   : > { %p2197_p0 = pnand %p2195_p10, %p2192_p9 }
  0xc0   : > { %2200 = shalt.err (!%p2197_p0)
}
  0xc1   : > { %s2201_s13 = scalar_lea.vmem %s365_s9, 16  ;;  %s2208_s21 = scalar_lea.vmem %s365_s9, 32 }
  0xc2   : > { %p2202_p5 = scmp.ne.s32.totalorder %s365_s9, %s2201_s13  ;;  %p2209_p13 = scmp.lt.s32.totalorder %s365_s9, %s365_s9 }
  0xc3   : > { %p2210_p2 = scmp.lt.s32.totalorder %s2208_s21, %s2201_s13 }
  0xc4   : > { %p2204_p1 = pnand %p2202_p5, %p3230_p8 }
  0xc5   : > { %p2211_p4 = por %p2210_p2, %p2209_p13 }
  0xc6   : > { %p2205_p11 = pneg %p2204_p1 }
  0xc8   : > { %p2212_p3 = pnand %p2211_p4, %p2205_p11 }
  0xca   : > { %2215 = shalt.err (!%p2212_p3)
}
  0xcb   : > { %p3231_p6 = scmp.ne.s32.totalorder %s3214_s27, 0  ;;  %s2216_s3 = scalar_lea.hbm %s3174_s6, 16 }
  0xcc   : > { %p2217_p7 = scmp.ne.s32.totalorder %s3174_s6, %s2216_s3  ;;  %p2223_p3 = scmp.lt.u32.totalorder %s2216_s3, %s3174_s6 }
  0xcd   : > { %1898 = dma.hbm_to_vmem [thread:$0]  (!%p3231_p6), %s3172_s4, 16, %s365_s9, [#allocation13]  }
  0xce   : > { %p2219_p9 = pnand %p2217_p7, %p3230_p8 }
  0xd0   : > { %p2220_p10 = pneg %p2219_p9 }
  0xd2   : > { %p2225_p0 = pnand %p2223_p3, %p2220_p10 }
  0xd4   : > { %2228 = shalt.err (!%p2225_p0)
}
  0xd5   : > { %s2229_s13 = scalar_lea.vmem %s389_s1, 16  ;;  %s2236_s9 = scalar_lea.vmem %s389_s1, 32 }
  0xd6   : > { %p2230_p5 = scmp.ne.s32.totalorder %s389_s1, %s2229_s13  ;;  %p2237_p13 = scmp.lt.s32.totalorder %s389_s1, %s389_s1 }
  0xd7   : > { %p2238_p2 = scmp.lt.s32.totalorder %s2236_s9, %s2229_s13 }
  0xd8   : > { %p2232_p1 = pnand %p2230_p5, %p3230_p8 }
  0xd9   : > { %p2239_p4 = por %p2238_p2, %p2237_p13 }
  0xda   : > { %p2233_p11 = pneg %p2232_p1 }
  0xdc   : > { %p2240_p12 = pnand %p2239_p4, %p2233_p11 }
  0xde   : > { %2243 = shalt.err (!%p2240_p12)
}
  0xdf   : > { %1904 = dma.hbm_to_vmem [thread:$0]  (!%p3231_p6), %s3174_s6, 16, %s389_s1, [#allocation16]  }
  0xe0   : > { %s2473_s5 = smov [#allocation20]   ;;  %s2474_s28 = smov [#allocation23]  }
  0xe1   : > { %s412_s22 = sshll.u32 %s2473_s5, 4  ;;  %s436_s3 = sshll.u32 %s2474_s28, 4  ;;  %s413_s22 = int_to_ptr.vmem [resolvable:$true] %s412_s22  ;;  %s437_s3 = int_to_ptr.vmem [resolvable:$true] %s436_s3 }
  0xe2   : > { %s2244_s0 = scalar_lea.hbm %s3176_s8, 16 }
  0xe3   : > { %p2245_p12 = scmp.ne.s32.totalorder %s3176_s8, %s2244_s0  ;;  %p2251_p10 = scmp.lt.u32.totalorder %s2244_s0, %s3176_s8 }
  0xe5   : > { %p2247_p7 = pnand %p2245_p12, %p3230_p8 }
  0xe7   : > { %p2248_p9 = pneg %p2247_p7 }
  0xe9   : > { %p2253_p3 = pnand %p2251_p10, %p2248_p9 }
  0xeb   : > { %2256 = shalt.err (!%p2253_p3)
}
  0xec   : > { %s2257_s1 = scalar_lea.vmem %s413_s22, 16  ;;  %s2264_s14 = scalar_lea.vmem %s413_s22, 32 }
  0xed   : > { %p2258_p0 = scmp.ne.s32.totalorder %s413_s22, %s2257_s1  ;;  %p2265_p11 = scmp.lt.s32.totalorder %s413_s22, %s413_s22 }
  0xee   : > { %p2266_p13 = scmp.lt.s32.totalorder %s2264_s14, %s2257_s1 }
  0xef   : > { %p2260_p5 = pnand %p2258_p0, %p3230_p8 }
  0xf0   : > { %p2267_p2 = por %p2266_p13, %p2265_p11 }
  0xf1   : > { %p2261_p1 = pneg %p2260_p5 }
  0xf3   : > { %p2268_p4 = pnand %p2267_p2, %p2261_p1 }
  0xf5   : > { %2271 = shalt.err (!%p2268_p4)
}
  0xf6   : > { %1910 = dma.hbm_to_vmem [thread:$0]  (!%p3231_p6), %s3176_s8, 16, %s413_s22, [#allocation19]  }
  0xf7   : > { %s2272_s0 = scalar_lea.hbm %s3178_s10, 16 }
  0xf8   : > { %p2273_p12 = scmp.ne.s32.totalorder %s3178_s10, %s2272_s0  ;;  %p2279_p10 = scmp.lt.u32.totalorder %s2272_s0, %s3178_s10 }
  0xfa   : > { %p2275_p7 = pnand %p2273_p12, %p3230_p8 }
  0xfc   : > { %p2276_p9 = pneg %p2275_p7 }
  0xfe   : > { %p2281_p3 = pnand %p2279_p10, %p2276_p9 }
 0x100   : > { %2284 = shalt.err (!%p2281_p3)
}
 0x101   : > { %s2285_s1 = scalar_lea.vmem %s437_s3, 16  ;;  %s2292_s22 = scalar_lea.vmem %s437_s3, 32 }
 0x102   : > { %p2286_p0 = scmp.ne.s32.totalorder %s437_s3, %s2285_s1  ;;  %p2293_p11 = scmp.lt.s32.totalorder %s437_s3, %s437_s3 }
 0x103   : > { %p2294_p13 = scmp.lt.s32.totalorder %s2292_s22, %s2285_s1 }
 0x104   : > { %p2288_p5 = pnand %p2286_p0, %p3230_p8 }
 0x105   : > { %p2295_p2 = por %p2294_p13, %p2293_p11 }
 0x106   : > { %p2289_p1 = pneg %p2288_p5 }
 0x108   : > { %p2296_p4 = pnand %p2295_p2, %p2289_p1 }
 0x10a   : > { %2299 = shalt.err (!%p2296_p4)
}
 0x10b   : > { %1916 = dma.hbm_to_vmem [thread:$0]  (!%p3231_p6), %s3178_s10, 16, %s437_s3, [#allocation22]  }
 0x10c   : > { %s3232_s2 = sld [smem:[#allocation38_spill]]  ;;  %s451_s0 = scalar_lea.vmem [#allocation6], %s2745_s12 }
 0x10d   : > { %s459_s27 = sshll.u32 %s451_s0, 4  ;;  %s3233_s9 = sld [smem:[#allocation40_spill]]  ;;  %s2872_s27 = int_to_ptr.vmem [resolvable:$true] %s459_s27 }
 0x10e   : > { %s3234_s1 = sand.u32 1, %s2450_s19   ;;  %p3235_p6 = scmp.ne.s32.totalorder %s3229_s7, 0 }
 0x10f   : > { %s448_s3 = scalar_lea.sflag [#allocation7], %s3234_s1 }
 0x112   : > { %s2869_s16 = scalar_lea.hbm %s3232_s2, %s2741_s26  ;;  %s2305_s11 = scalar_lea.hbm %s3232_s2, 256 }
 0x113   : > { %s2878_s21 = scalar_lea.hbm %s3233_s9, %s2741_s26  ;;  %s2300_s22 = scalar_lea.hbm %s2869_s16, 128 }
 0x114   : > { %p2301_p8 = scmp.ne.s32.totalorder %s2869_s16, %s2300_s22  ;;  %p2306_p9 = scmp.lt.u32.totalorder %s2869_s16, %s3232_s2 }
 0x115   : > { %p2307_p10 = scmp.lt.u32.totalorder %s2305_s11, %s2300_s22  ;;  %p2309_p0 = scmp.lt.u32.totalorder %s2300_s22, %s2869_s16 }
 0x116   : > { %p2303_p12 = pnand %p2301_p8, %p3235_p6 }
 0x117   : > { %p2308_p3 = por %p2307_p10, %p2306_p9 }
 0x118   : > { %p2304_p7 = pneg %p2303_p12 }
 0x119   : > { %p2310_p5 = por %p2309_p0, %p2308_p3 }
 0x11b   : > { %p2311_p1 = pnand %p2310_p5, %p2304_p7 }
 0x11d   : > { %2314 = shalt.err (!%p2311_p1)
}
 0x11e   : > { %s2315_s26 = scalar_lea.vmem %s2872_s27, 128  ;;  %s2475_s24 = smov [#allocation6]  }
 0x11f   : > { %p2316_p11 = scmp.ne.s32.totalorder %s2872_s27, %s2315_s26  ;;  %s2320_s13 = sshll.u32 %s2475_s24, 4  ;;  %s2321_s13 = int_to_ptr.vmem [resolvable:$false] %s2320_s13 }
 0x120   : > { %s2322_s1 = scalar_lea.vmem %s2321_s13, 256  ;;  %p2323_p4 = scmp.lt.s32.totalorder %s2872_s27, %s2321_s13 }
 0x121   : > { %p2318_p13 = pnand %p2316_p11, %p3235_p6  ;;  %p2324_p8 = scmp.lt.s32.totalorder %s2322_s1, %s2315_s26 }
 0x123   : > { %p2319_p2 = pneg %p2318_p13  ;;  %p2325_p12 = por %p2324_p8, %p2323_p4 }
 0x125   : > { %p2326_p9 = pnand %p2325_p12, %p2319_p2 }
 0x127   : > { %2329 = shalt.err (!%p2326_p9)
}
 0x128   : > { %p3236_p7 = scmp.ne.s32.totalorder %s3227_s29, 0  ;;  %s489_s22 = scalar_lea.vmem [#allocation11], %s2745_s12 }
 0x129   : > { %s497_s14 = sshll.u32 %s489_s22, 4  ;;  %s2330_s5 = scalar_lea.hbm %s2878_s21, 128  ;;  %s498_s14 = int_to_ptr.vmem [resolvable:$true] %s497_s14 }
 0x12a   : > { %1920 = dma.hbm_to_vmem [thread:$0]  (!%p3236_p7), %s2869_s16, 128, %s2872_s27, %s448_s3  }
 0x12b   : > { %p2331_p10 = scmp.ne.s32.totalorder %s2878_s21, %s2330_s5  ;;  %s2335_s0 = scalar_lea.hbm %s3233_s9, 256 }
 0x12c   : > { %p2336_p5 = scmp.lt.u32.totalorder %s2878_s21, %s3233_s9  ;;  %p2337_p1 = scmp.lt.u32.totalorder %s2335_s0, %s2330_s5 }
 0x12d   : > { %p2333_p3 = pnand %p2331_p10, %p3235_p6  ;;  %p2339_p13 = scmp.lt.u32.totalorder %s2330_s5, %s2878_s21 }
 0x12e   : > { %p2338_p11 = por %p2337_p1, %p2336_p5 }
 0x12f   : > { %p2334_p0 = pneg %p2333_p3 }
 0x130   : > { %p2340_p2 = por %p2339_p13, %p2338_p11 }
 0x132   : > { %p2341_p4 = pnand %p2340_p2, %p2334_p0 }
 0x134   : > { %2344 = shalt.err (!%p2341_p4)
}
 0x135   : > { %s2345_s12 = scalar_lea.vmem %s498_s14, 128  ;;  %s2476_s16 = smov [#allocation11]  }
 0x136   : > { %p2346_p8 = scmp.ne.s32.totalorder %s498_s14, %s2345_s12  ;;  %s2350_s27 = sshll.u32 %s2476_s16, 4  ;;  %s2351_s27 = int_to_ptr.vmem [resolvable:$false] %s2350_s27 }
 0x137   : > { %s2352_s3 = scalar_lea.vmem %s2351_s27, 256  ;;  %p2353_p10 = scmp.lt.s32.totalorder %s498_s14, %s2351_s27 }
 0x138   : > { %p2348_p12 = pnand %p2346_p8, %p3235_p6  ;;  %p2354_p3 = scmp.lt.s32.totalorder %s2352_s3, %s2345_s12 }
 0x13a   : > { %p2349_p9 = pneg %p2348_p12  ;;  %p2355_p7 = por %p2354_p3, %p2353_p10 }
 0x13c   : > { %p2356_p1 = pnand %p2355_p7, %p2349_p9 }
 0x13e   : > { %2359 = shalt.err (!%p2356_p1)
}
 0x13f   : > { %p3237_p5 = scmp.ne.s32.totalorder %s3227_s29, 0  ;;  %s3238_s13 = sld [smem:[#allocation35_spill]] }
 0x141   : > { %1926 = dma.hbm_to_vmem [thread:$0]  (!%p3237_p5), %s2878_s21, 128, %s498_s14, %s2763_s25  }
 0x145   : > { %p3239_p0 = scmp.ne.s32.totalorder %s3238_s13, 0 }
 0x146   : > { %s2925_s7 = sand.u32 (!%p3239_p0), 1, %s2446_s18   ;;  %p3240_p6 = scmp.ne.s32.totalorder (!%p3239_p0), %s3223_s15, 0 }
 0x147   : > { %506 = sbr.rel (%p3239_p0) target bundleno = 1838 (0x72e), region = 64  ;;  %s2928_s1 = sshll.u32 (!%p3239_p0), %s2925_s7, 3 }
 0x148   : > { %s509_s22 = scalar_lea.sflag (!%p3239_p0), [#allocation7], %s2925_s7  ;;  %s512_s5 = scalar_lea.vmem (!%p3239_p0), [#allocation6], %s2928_s1 }
 0x14e   : > { %2413 = dma.done.wait (%p3240_p6), %s509_s22, 128  }
 0x14f   : > { %2415 = vsyncadd (%p3240_p6), %s509_s22, 4294967168  ;;  %s517_s29 = sand.u32 1, %s2579_s23   ;;  %s521_s21 = scalar_lea.vmem [#allocation9], %s2928_s1 }
 0x150   : > { %s518_s25 = scalar_lea.sflag [#allocation10], %s517_s29 }
 0x151   : > { %2417 = dma.done.wait (%p3240_p6), %s518_s25, 256  }
 0x152   : > { %2419 = vsyncadd (%p3240_p6), %s518_s25, 4294967040  ;;  %s530_s14 = scalar_lea.vmem [#allocation11], %s2928_s1  ;;  %p3241_p7 = scmp.eq.s32.totalorder %s2579_s23, 0 }
 0x154   : > { %2421 = dma.done.wait (%p3241_p7), [#allocation13], 528   ;;  %p3242_p11 = pmov %p3241_p7 }
 0x155   : > { %p3243_p13 = pmov %p3241_p7 }
 0x156   : > { %2423 = vsyncadd (%p3242_p11), [#allocation13], 4294966768 }
 0x157   : > { %2425 = dma.done.wait (%p3243_p13), [#allocation16], 528   ;;  %p3244_p2 = pmov %p3241_p7 }
 0x159   : > { %2427 = vsyncadd (%p3244_p2), [#allocation16], 4294966768  ;;  %p3245_p4 = pmov %p3244_p2 }
 0x15a   : > { %p3246_p8 = pmov %p3244_p2 }
 0x15b   : > { %2429 = dma.done.wait (%p3245_p4), [#allocation19], 528  }
 0x15c   : > { %2431 = vsyncadd (%p3246_p8), [#allocation19], 4294966768  ;;  %p3247_p12 = pmov %p3244_p2 }
 0x15d   : > { %p3248_p9 = pmov %p3244_p2 }
 0x15e   : > { %2433 = dma.done.wait (%p3247_p12), [#allocation22], 528  }
 0x15f   : > { %2435 = vsyncadd (%p3248_p9), [#allocation22], 4294966768  ;;  %vm631_vm0 = vcmask 261120   ;;  %v2477_v0 = vmov 0.0   ;;  %vm2478_vm1 = vmmov 0   ;;  %v618_v1 = vld [vmem:[#allocation12] sm:$0xff] }
 0x160   : > { %1772 = vmatprep.subr.bf16.mxu0 %v2477_v0  ;;  %1780 = vmatprep.subr.bf16.mxu1 %v2477_v0  ;;  %688 = vst.msk [vmem:[#allocation5] sm:$0xff] %vm631_vm0, %v2477_v0  ;;  %v619_v2 = vld [vmem:[#allocation12 + $0x8] sm:$0xff]  ;;  %v620_v6 = vld [vmem:[#allocation12 + $0x10] sm:$0xff]  ;;  %v621_v7 = vld [vmem:[#allocation12 + $0x18] sm:$0xff]  ;;  %vm809_vm2 = vcmask 64512   ;;  %vm677_vm3 = vcmask 257024  }
 0x161   : > { %1776 = vmatprep.mubr.msk.bf16.mxu0 %vm2478_vm1, %v2477_v0  ;;  %1784 = vmatprep.mubr.msk.bf16.mxu1 %vm2478_vm1, %v2477_v0  ;;  %v691_v3 = vld [vmem:[#allocation15] sm:$0xff]  ;;  %v622_v4 = vpack.c.bf16 %v619_v2, %v618_v1  ;;  %v692_v5 = vld [vmem:[#allocation15 + $0x8] sm:$0xff]  ;;  %v693_v9 = vld [vmem:[#allocation15 + $0x10] sm:$0xff]  ;;  %v623_v11 = vpack.c.bf16 %v621_v7, %v620_v6  ;;  %s2479_s23 = smov 120   ;;  %s2480_s15 = smov 112   ;;  %vm679_vm4 = vcmask 7168  }
 0x162   : > { %v695_v8 = vpack.c.bf16 %v692_v5, %v691_v3  ;;  %v694_v10 = vld [vmem:[#allocation15 + $0x18] sm:$0xff]  ;;  %v1723_v18 = vld [vmem:[#allocation17] ss:$0 sm:$0xff]  ;;  %s2481_s11 = smov 104   ;;  %v751_v37 = vld [vmem:[#allocation18] sm:$0xff]  ;;  %v2482_v59 = vmov -inf  }
 0x163   : > { %1773 = vmatpush3.bf16.msra.mxu0 %v622_v4  ;;  %v616_v12 = vld [vmem:[%s512_s5] sm:$0xff]  ;;  %v696_v13 = vpack.c.bf16 %v694_v10, %v693_v9  ;;  %v689_v14 = vld [vmem:[%s521_s21] sm:$0xff]  ;;  %680 = vst.msk [vmem:[#allocation3] sm:$0xff] %vm679_vm4, %v2482_v59  ;;  %681 = vst.msk [vmem:[#allocation3 + $0x8] sm:$0xff] %vm679_vm4, %v2482_v59  ;;  %v2483_v60 = vmov 0   ;;  %vm891_vm5 = vcmask 1043456  }
 0x164   : > { %1781 = vmatpush3.bf16.msra.mxu1 %v695_v8  ;;  %1774 = vmatprep.subr.bf16.mxu0 %v2477_v0  ;;  %v617_v15 = vpack.c.bf16 %v616_v12, %v616_v12  ;;  %v690_v16 = vpack.c.bf16 %v689_v14, %v689_v14  ;;  %v1721_v17 = vld [vmem:[#allocation14] ss:$0 sm:$0xff]  ;;  %v752_v38 = vld [vmem:[#allocation18 + $0x8] sm:$0xff]  ;;  %v753_v39 = vld [vmem:[#allocation18 + $0x10] sm:$0xff]  ;;  %682 = vst.msk [vmem:[#allocation3 + $0x10] sm:$0xff] %vm679_vm4, %v2482_v59  ;;  %s2484_s28 = smov 8  }
 0x165   : > { %1782 = vmatprep.subr.bf16.mxu1 %v2477_v0  ;;  %v755_v40 = vpack.c.bf16 %v752_v38, %v751_v37  ;;  %v754_v41 = vld [vmem:[#allocation18 + $0x18] sm:$0xff]  ;;  %683 = vst.msk [vmem:[#allocation3 + $0x18] sm:$0xff] %vm679_vm4, %v2482_v59  ;;  %684 = vst.msk [vmem:[#allocation4] sm:$0xff] %vm679_vm4, %v2477_v0  ;;  %2017 = vset.pattern.permute.xlu1 %v2483_v60  ;;  %s2485_s0 = smov 16   ;;  %s2486_s26 = smov 24   ;;  %vm1080_vm6 = vcmask 130112  }
 0x166   : > { %v756_v42 = vpack.c.bf16 %v754_v41, %v753_v39  ;;  %v749_v43 = vld [vmem:[%s530_s14] sm:$0xff]  ;;  %685 = vst.msk [vmem:[#allocation4 + $0x8] sm:$0xff] %vm679_vm4, %v2477_v0  ;;  %686 = vst.msk [vmem:[#allocation4 + $0x10] sm:$0xff] %vm679_vm4, %v2477_v0  ;;  %2018 = vset.pattern.permute.xlu0 %v2483_v60  ;;  %vm1223_vm7 = vcmask 195712   ;;  %vm1366_vm8 = vcmask 261312   ;;  %s3249_s24 = sld [smem:[#allocation32_spill]] }
 0x167   : > { %1775 = vmatpush3.bf16.msra.mxu0 %v623_v11  ;;  %v750_v44 = vpack.c.bf16 %v749_v43, %v749_v43  ;;  %687 = vst.msk [vmem:[#allocation4 + $0x18] sm:$0xff] %vm679_vm4, %v2477_v0  ;;  %s610_s16 = scalar_lea.vmem [#allocation24], %s2928_s1  ;;  %s3250_s22 = sld [smem:[#allocation45_spill]] }
 0x168   : > { %1783 = vmatpush3.bf16.msra.mxu1 %v696_v13  ;;  %1788 = vmatprep.subr.bf16.mxu0 %v2477_v0  ;;  %s1486_s27 = sshll.u32 %s610_s16, 4  ;;  %s1472_s25 = scalar_lea.sflag [#allocation8], %s2925_s7  ;;  %s3120_s27 = int_to_ptr.vmem [resolvable:$true] %s1486_s27 }
 0x169   : > { %1796 = vmatprep.subr.bf16.mxu1 %v2477_v0  ;;  %s2360_s1 = scalar_lea.vmem %s3120_s27, 128  ;;  %p3252_p3 = scmp.ne.s32.totalorder %s3224_s20, 0 }
 0x16a   : > { %1777 = vmatmul.mubr.msk.bf16.vlgmr.msra.gmra.mrb[0].mxu0 %vm631_vm0, %v617_v15  ;;  %v3042_v13 = vld [vmem:[#allocation3] sm:$0xff]  ;;  %p2361_p10 = scmp.ne.s32.totalorder %s3120_s27, %s2360_s1  ;;  %s2487_s21 = smov [#allocation24]  }
 0x16b   : > { %1785 = vmatmul.mubr.msk.bf16.vlgmr.msra.gmra.mrb[0].mxu1 %vm631_vm0, %v690_v16  ;;  %1792 = vmatprep.mubr.msk.bf16.mxu0 %vm2478_vm1, %v2477_v0  ;;  %s2364_s14 = sshll.u32 %s2487_s21, 4  ;;  %s2365_s14 = int_to_ptr.vmem [resolvable:$false] %s2364_s14 }
 0x16c   : > { %1798 = vmatprep.mubr.msk.bf16.mxu1 %vm2478_vm1, %v2477_v0  ;;  %1789 = vmatpush3.bf16.msra.mxu0 %v755_v40  ;;  %s1741_s12 = sshll.u32 %s3249_s24, 7  ;;  %p2362_p1 = pnand %p2361_p10, %p3252_p3 }
 0x16d   : > { %1790 = vmatprep.subr.bf16.mxu0 %v2477_v0  ;;  %s3251_s5 = smov %s3250_s22  ;;  %s3118_s29 = scalar_lea.hbm %s3250_s22, %s1741_s12 }
 0x16e   : > { %p2363_p5 = pneg %p2362_p1  ;;  %p2367_p0 = scmp.lt.s32.totalorder %s3120_s27, %s2365_s14 }
 0x170   : > { %1791 = vmatpush3.bf16.msra.mxu0 %v756_v42 }
 0x171   : > { %1802 = vmatprep.subr.bf16.mxu0 %v2477_v0 }
 0x173   : > { %1793 = vmatmul.mubr.msk.bf16.vlgmr.msra.gmra.mrb[4].mxu0 %vm631_vm0, %v750_v44 }
 0x174   : > { %1804 = vmatprep.mubr.msk.bf16.mxu0 %vm2478_vm1, %v2477_v0 }
 0x23d   : > { %v669_v19 = vpop.f32.mrb[0].mxu0 }
 0x23e   : > { %v670_v20 = vadd.f32 %v1721_v17, %v669_v19  ;;  %v1778_v21 = vpop.f32.mrb[1].mxu0  ;;  %v742_v22 = vpop.f32.mrb[0].mxu1  ;;  %v1725_v17 = vld [vmem:[#allocation20] ss:$0 sm:$0xff] }
 0x23f   : > { %v743_v23 = vadd.f32 %v1723_v18, %v742_v22  ;;  %v672_v24 = vpop.f32.mrb[2].mxu0  ;;  %v1786_v25 = vpop.f32.mrb[1].mxu1 }
 0x240   : > { %v675_v26 = vmul.f32 0.35355338, %v670_v20  ;;  %v1779_v27 = vpop.f32.mrb[3].mxu0  ;;  %v745_v28 = vpop.f32.mrb[2].mxu1  ;;  %v3054_v25 = vld [vmem:[#allocation3 + $0x8] sm:$0xff] }
 0x241   : > { %v748_v29 = vpack.c.bf16 %v743_v23, %v743_v23  ;;  %v1787_v30 = vpop.f32.mrb[3].mxu1 }
 0x242   : > { %v676_v31 = vpack.c.bf16 %v675_v26, %v675_v26 }
 0x243   : > { %945 = vrot.lane.b32.xlu0 %v748_v29, %s2479_s23  ;;  %v814_v32 = vsel %vm809_vm2, %v748_v29, 0  ;;  %1089 = vrot.lane.b32.xlu1 %v748_v29, %s2480_s15 }
 0x244   : > { %678 = vst.msk [vmem:[#allocation2] sm:$0xf] %vm677_vm3, %v676_v31  ;;  %1797 = vmatpush3.bf16.xpose.msra.mxu1 %v814_v32 }
 0x245   : > { %1808 = vmatprep.subr.bf16.mxu1 %v2477_v0 }
 0x246   : > { %v801_v15 = vpop.f32.mrb[4].mxu0 }
 0x247   : > { %v1794_v18 = vpop.f32.mrb[5].mxu0  ;;  %v802_v22 = vadd.f32 %v1725_v17, %v801_v15 }
 0x248   : > { %v804_v19 = vpop.f32.mrb[6].mxu0 }
 0x249   : > { %v1795_v21 = vpop.f32.mrb[7].mxu0  ;;  %v807_v23 = vpack.c.bf16 %v802_v22, %v802_v22  ;;  %v1011_v22 = vld [vmem:[#allocation4 + $0x8] sm:$0xff] }
 0x24b   : > { %v808_v33 = vld [vmem:[#allocation2] sm:$0xf]  ;;  %v893_v24 = vsel %vm891_vm5, %v807_v23, 0 }
 0x24c   : > { %v2019_v34 = vld [vmem:[#allocation2] ss:$0 sps:$4 sm:$0xff]   ;;  %1799 = vmatmul.mubr.msk.bf16.vlgmr.msra.gmra.mrb[4].mxu1 %vm809_vm2, %v808_v33  ;;  %1803 = vmatpush3.bf16.msra.mxu0 %v893_v24 }
 0x24d   : > { %v2020_v35 = vld [vmem:[#allocation2] ss:$0 sps:$4 sm:$0xff]   ;;  %1087 = vrot.lane.b32.xlu1 %v2019_v34, %s2480_s15  ;;  %1810 = vmatprep.mubr.msk.bf16.mxu1 %vm2478_vm1, %v2477_v0 }
 0x24e   : > { %942 = vrot.lane.b32.xlu0 %v2020_v35, %s2479_s23  ;;  %v2021_v36 = vld [vmem:[#allocation2] ss:$0 sps:$4 sm:$0xff]   ;;  %1814 = vmatprep.subr.bf16.mxu0 %v2477_v0 }
 0x24f   : > { %v1281_v35 = vld [vmem:[#allocation3 + $0x18] sm:$0xff] }
 0x251   : > { %1230 = vrot.lane.b32.xlu1 %v2021_v36, %s2481_s11 }
 0x252   : > { %1232 = vrot.lane.b32.xlu0 %v748_v29, %s2481_s11  ;;  %v3064_v29 = vld [vmem:[#allocation3 + $0x10] sm:$0xff] }
 0x2b5   : > { %v946_v45 = vpop.permute.xlu0 %945  ;;  %v1090_v47 = vpop.permute.xlu1 %1089 }
 0x2b6   : > { %v951_v46 = vsel %vm809_vm2, %v946_v45, 0  ;;  %v1095_v49 = vsel %vm809_vm2, %v1090_v47, 0 }
 0x2b7   : > { %1809 = vmatpush3.bf16.xpose.msra.mxu1 %v951_v46 }
 0x2b8   : > { %1820 = vmatprep.subr.bf16.mxu1 %v2477_v0 }
 0x2bf   : > { %v1088_v51 = vpop.permute.xlu1 %1087 }
 0x2c0   : > { %v943_v48 = vpop.permute.xlu0 %942 }
 0x2c1   : > { %1811 = vmatmul.mubr.msk.bf16.vlgmr.msra.gmra.mrb[8].mxu1 %vm809_vm2, %v943_v48 }
 0x2c2   : > { %1821 = vmatpush3.bf16.xpose.msra.mxu1 %v1095_v49  ;;  %1822 = vmatprep.mubr.msk.bf16.mxu1 %vm2478_vm1, %v2477_v0 }
 0x2c3   : > { %1832 = vmatprep.subr.bf16.mxu1 %v2477_v0  ;;  %v1231_v53 = vpop.permute.xlu1 %1230 }
 0x2c4   : > { %v1233_v50 = vpop.permute.xlu0 %1232 }
 0x2c5   : > { %v1238_v52 = vsel %vm809_vm2, %v1233_v50, 0 }
 0x2c9   : > { %1823 = vmatmul.mubr.msk.bf16.vlgmr.msra.gmra.mrb[12].mxu1 %vm809_vm2, %v1088_v51 }
 0x2ca   : > { %1833 = vmatpush3.bf16.xpose.msra.mxu1 %v1238_v52  ;;  %1834 = vmatprep.mubr.msk.bf16.mxu1 %vm2478_vm1, %v2477_v0 }
 0x2cb   : > { %1844 = vmatprep.subr.bf16.mxu1 %v2477_v0 }
 0x2d1   : > { %1835 = vmatmul.mubr.msk.bf16.vlgmr.msra.gmra.mrb[16].mxu1 %vm809_vm2, %v1231_v53 }
 0x2d2   : > { %1848 = vmatprep.mubr.msk.bf16.mxu1 %vm2478_vm1, %v2477_v0 }
 0x31f   : > { %v3014_v54 = vpop.f32.mrb[4].mxu1 }
 0x320   : > { %v1800_v55 = vpop.f32.mrb[5].mxu1  ;;  %v857_v56 = vsel %vm809_vm2, %v3014_v54, -inf }
 0x321   : > { %858 = vmax.xlane.f32.xlu0 %v857_v56  ;;  %v853_v57 = vpop.f32.mrb[6].mxu1 }
 0x322   : > { %v1801_v58 = vpop.f32.mrb[7].mxu1 }
 0x394   : > { %v3030_v61 = vpop.f32.mrb[8].mxu1 }
 0x395   : > { %v1812_v62 = vpop.f32.mrb[9].mxu1  ;;  %v995_v63 = vsel %vm809_vm2, %v3030_v61, -inf }
 0x396   : > { %996 = vmax.xlane.f32.xlu1 %v995_v63  ;;  %v990_v1 = vpop.f32.mrb[10].mxu1 }
 0x397   : > { %v1813_v2 = vpop.f32.mrb[11].mxu1 }
 0x39c   : > { %v3034_v3 = vpop.f32.mrb[12].mxu1 }
 0x39d   : > { %v1824_v4 = vpop.f32.mrb[13].mxu1  ;;  %v1139_v5 = vsel %vm809_vm2, %v3034_v3, -inf }
 0x39e   : > { %1140 = vmax.xlane.f32.xlu0 %v1139_v5  ;;  %v1134_v6 = vpop.f32.mrb[14].mxu1 }
 0x39f   : > { %v1825_v7 = vpop.f32.mrb[15].mxu1 }
 0x3a4   : > { %v3038_v8 = vpop.f32.mrb[16].mxu1 }
 0x3a5   : > { %v1836_v9 = vpop.f32.mrb[17].mxu1  ;;  %v1282_v10 = vsel %vm809_vm2, %v3038_v8, -inf }
 0x3a6   : > { %1283 = vmax.xlane.f32.xlu0 %v1282_v10  ;;  %v1277_v11 = vpop.f32.mrb[18].mxu1 }
 0x3a7   : > { %v1837_v12 = vpop.f32.mrb[19].mxu1  ;;  %v872_v11 = vld [vmem:[#allocation4] sm:$0xff] }
 0x3ae   : > { %v859_v14 = vpop.xlane.xlu0 %858 }
 0x3af   : > { %v3045_v16 = vmax.f32 %v3042_v13, %v859_v14 }
 0x3b1   : > { %v861_v20 = vsub.f32 %v3042_v13, %v3045_v16  ;;  %937 = vst.msk [vmem:[#allocation3] sm:$0xff] %vm679_vm4, %v3045_v16  ;;  %866 = vperm.xlu1 %2017, %v3045_v16  }
 0x3b3   : > { %v862_v60 = vmul.f32 1.442695, %v861_v20 }
 0x423   : > { %v997_v26 = vpop.xlane.xlu1 %996 }
 0x424   : > { %v3057_v27 = vmax.f32 %v3054_v25, %v997_v26  ;;  %v1155_v26 = vld [vmem:[#allocation4 + $0x10] sm:$0xff] }
 0x426   : > { %v999_v28 = vsub.f32 %v3054_v25, %v3057_v27  ;;  %1082 = vst.msk [vmem:[#allocation3 + $0x8] sm:$0xff] %vm679_vm4, %v3057_v27  ;;  %1004 = vperm.xlu0 %2018, %v3057_v27   ;;  %v880_v27 = vld [vmem:[#allocation5] sm:$0xff] }
 0x428   : > { %v1000_v2 = vmul.f32 1.442695, %v999_v28 }
 0x42b   : > { %v1141_v30 = vpop.xlane.xlu0 %1140 }
 0x42c   : > { %v1142_v31 = vmax.f32 %v3064_v29, %v1141_v30 }
 0x42e   : > { %v1143_v32 = vsub.f32 %v3064_v29, %v1142_v31  ;;  %1225 = vst.msk [vmem:[#allocation3 + $0x10] sm:$0xff] %vm679_vm4, %v1142_v31  ;;  %1148 = vperm.xlu1 %2017, %v1142_v31  }
 0x430   : > { %v867_v33 = vpop.permute.xlu1 %866 }
 0x431   : > { %v869_v34 = vsub.f32 %v3014_v54, %v867_v33 }
 0x432   : > { %1027 = vrot.lane.b32.xlu1 %v807_v23, %s2479_s23  ;;  %s2366_s23 = scalar_lea.vmem %s2365_s14, 256 }
 0x433   : > { %v870_v36 = vmul.f32 1.442695, %v869_v34  ;;  %v1284_v37 = vpop.xlane.xlu0 %1283  ;;  %p2368_p6 = scmp.lt.s32.totalorder %s2366_s23, %s2360_s1 }
 0x434   : > { %v1285_v38 = vmax.f32 %v1281_v35, %v1284_v37  ;;  %v1298_v37 = vld [vmem:[#allocation4 + $0x18] sm:$0xff] }
 0x435   : > { %2022 = vpow2.f32 %v870_v36  ;;  %p2369_p7 = por %p2368_p6, %p2367_p0 }
 0x436   : > { %v1286_v39 = vsub.f32 %v1281_v35, %v1285_v38  ;;  %1368 = vst.msk [vmem:[#allocation3 + $0x18] sm:$0xff] %vm679_vm4, %v1285_v38  ;;  %1291 = vperm.xlu1 %2017, %v1285_v38  }
 0x437   : > { %p2370_p11 = pnand %p2369_p7, %p2363_p5 }
 0x438   : > { %v1287_v5 = vmul.f32 1.442695, %v1286_v39 }
 0x43a   : > { %1170 = vrot.lane.b32.xlu1 %v807_v23, %s2480_s15 }
 0x43e   : > { %1313 = vrot.lane.b32.xlu1 %v807_v23, %s2481_s11 }
 0x43f   : > { %v2023_v40 = vpop.eup %2022 }
 0x440   : > { %v887_v41 = vpack.c.bf16 %v2023_v40, %v2023_v40  ;;  %v874_v42 = vsel %vm809_vm2, %v2023_v40, 0.0 }
 0x442   : > { %1805 = vmatmul.mubr.msk.bf16.vlgmr.msra.gmra.mrb[8].mxu0 %vm809_vm2, %v887_v41 }
 0x443   : > { %1816 = vmatprep.mubr.msk.bf16.mxu0 %vm2478_vm1, %v2477_v0 }
 0x462   : > { %875 = vadd.xlane.f32.xlu1 %v874_v42 }
 0x4a5   : > { %v1005_v43 = vpop.permute.xlu0 %1004 }
 0x4a6   : > { %v1007_v44 = vsub.f32 %v3030_v61, %v1005_v43 }
 0x4a8   : > { %v1008_v45 = vmul.f32 1.442695, %v1007_v44 }
 0x4aa   : > { %2024 = vpow2.f32 %v1008_v45 }
 0x4ad   : > { %v1149_v46 = vpop.permute.xlu1 %1148 }
 0x4ae   : > { %v1151_v47 = vsub.f32 %v3034_v3, %v1149_v46  ;;  %v1144_v3 = vmul.f32 1.442695, %v1143_v32 }
 0x4b0   : > { %v1152_v48 = vmul.f32 1.442695, %v1151_v47 }
 0x4b1   : > { %v1028_v49 = vpop.permute.xlu1 %1027 }
 0x4b2   : > { %2026 = vpow2.f32 %v1152_v48  ;;  %v1033_v50 = vsel %vm891_vm5, %v1028_v49, 0 }
 0x4b3   : > { %1815 = vmatpush3.bf16.msra.mxu0 %v1033_v50 }
 0x4b4   : > { %v2025_v51 = vpop.eup %2024  ;;  %1826 = vmatprep.subr.bf16.mxu0 %v2477_v0 }
 0x4b5   : > { %v1292_v52 = vpop.permute.xlu1 %1291  ;;  %v1013_v53 = vsel %vm809_vm2, %v2025_v51, 0.0  ;;  %v1025_v54 = vpack.c.bf16 %v2025_v51, %v2025_v51 }
 0x4b6   : > { %v1294_v55 = vsub.f32 %v3038_v8, %v1292_v52  ;;  %1014 = vadd.xlane.f32.xlu0 %v1013_v53 }
 0x4b7   : > { %1817 = vmatmul.mubr.msk.bf16.vlgmr.msra.gmra.mrb[12].mxu0 %vm809_vm2, %v1025_v54 }
 0x4b8   : > { %v1295_v56 = vmul.f32 1.442695, %v1294_v55  ;;  %1828 = vmatprep.mubr.msk.bf16.mxu0 %vm2478_vm1, %v2477_v0 }
 0x4b9   : > { %v1171_v57 = vpop.permute.xlu1 %1170 }
 0x4ba   : > { %2028 = vpow2.f32 %v1295_v56  ;;  %v1176_v58 = vsel %vm891_vm5, %v1171_v57, 0  ;;  %v1414_v57 = vld [vmem:[#allocation21] sm:$0xff] }
 0x4bb   : > { %1827 = vmatpush3.bf16.msra.mxu0 %v1176_v58  ;;  %2030 = vpow2.f32 %v862_v60  ;;  %v1415_v58 = vld [vmem:[#allocation21 + $0x8] sm:$0xff] }
 0x4bc   : > { %v2027_v59 = vpop.eup %2026  ;;  %1838 = vmatprep.subr.bf16.mxu0 %v2477_v0  ;;  %2032 = vpow2.f32 %v1000_v2  ;;  %v1418_v60 = vpack.c.bf16 %v1415_v58, %v1414_v57 }
 0x4bd   : > { %v1314_v61 = vpop.permute.xlu1 %1313  ;;  %v1157_v62 = vsel %vm809_vm2, %v2027_v59, 0.0  ;;  %v1169_v63 = vpack.c.bf16 %v2027_v59, %v2027_v59  ;;  %2034 = vpow2.f32 %v1144_v3  ;;  %v1416_v59 = vld [vmem:[#allocation21 + $0x10] sm:$0xff] }
 0x4be   : > { %v1319_v1 = vsel %vm891_vm5, %v1314_v61, 0  ;;  %1158 = vadd.xlane.f32.xlu1 %v1157_v62  ;;  %2036 = vpow2.f32 %v1287_v5  ;;  %v1417_v61 = vld [vmem:[#allocation21 + $0x18] sm:$0xff]  ;;  %1845 = vmatpush3.bf16.msra.mxu1 %v1418_v60 }
 0x4bf   : > { %1829 = vmatmul.mubr.msk.bf16.vlgmr.msra.gmra.mrb[16].mxu0 %vm809_vm2, %v1169_v63  ;;  %v1419_v62 = vpack.c.bf16 %v1417_v61, %v1416_v59  ;;  %1846 = vmatprep.subr.bf16.mxu1 %v2477_v0 }
 0x4c0   : > { %1839 = vmatpush3.bf16.msra.mxu0 %v1319_v1  ;;  %1840 = vmatprep.mubr.msk.bf16.mxu0 %vm2478_vm1, %v2477_v0 }
 0x4c2   : > { %1847 = vmatpush3.bf16.msra.mxu1 %v1419_v62 }
 0x4c4   : > { %v2029_v4 = vpop.eup %2028 }
 0x4c5   : > { %v1312_v6 = vpack.c.bf16 %v2029_v4, %v2029_v4  ;;  %v2031_v7 = vpop.eup %2030  ;;  %v1300_v15 = vsel %vm809_vm2, %v2029_v4, 0.0 }
 0x4c6   : > { %v2033_v8 = vpop.eup %2032  ;;  %v873_v12 = vmul.f32 %v2031_v7, %v872_v11 }
 0x4c7   : > { %1841 = vmatmul.mubr.msk.bf16.vlgmr.msra.gmra.mrb[20].mxu0 %vm809_vm2, %v1312_v6  ;;  %v2035_v9 = vpop.eup %2034  ;;  %v1012_v23 = vmul.f32 %v2033_v8, %v1011_v22 }
 0x4c8   : > { %v2037_v10 = vpop.eup %2036  ;;  %v1156_v28 = vmul.f32 %v2035_v9, %v1155_v26 }
 0x4c9   : > { %v1299_v38 = vmul.f32 %v2037_v10, %v1298_v37 }
 0x4cc   : > { %883 = vperm.xlu0 %2018, %v2031_v7  }
 0x4cf   : > { %1021 = vperm.xlu1 %2017, %v2033_v8  }
 0x4d0   : > { %1165 = vperm.xlu0 %2018, %v2035_v9  }
 0x4d4   : > { %1308 = vperm.xlu0 %2018, %v2037_v10  }
 0x4ef   : > { %v876_v13 = vpop.xlane.xlu1 %875 }
 0x4f0   : > { %v877_v14 = vadd.f32 %v876_v13, %v873_v12 }
 0x4f2   : > { %879 = vst.msk [vmem:[#allocation4] sm:$0xff] %vm679_vm4, %v877_v14 }
 0x4f3   : > { %1301 = vadd.xlane.f32.xlu1 %v1300_v15 }
 0x4f9   : > { %v1373_v16 = vld [vmem:[#allocation4] sm:$0xff] }
 0x4fa   : > { %2038 = vrcp.f32 %v1373_v16 }
 0x504   : > { %v2039_v17 = vpop.eup %2038 }
 0x505   : > { %1377 = vperm.xlu0 %2018, %v2039_v17  }
 0x515   : > { %v929_v18 = vpop.f32.mrb[8].mxu0 }
 0x516   : > { %v1806_v19 = vpop.f32.mrb[9].mxu0 }
 0x517   : > { %v932_v20 = vpop.f32.mrb[10].mxu0 }
 0x518   : > { %v1807_v21 = vpop.f32.mrb[11].mxu0 }
 0x543   : > { %v1015_v24 = vpop.xlane.xlu0 %1014 }
 0x544   : > { %v1016_v25 = vadd.f32 %v1015_v24, %v1012_v23 }
 0x546   : > { %1017 = vst.msk [vmem:[#allocation4 + $0x8] sm:$0xff] %vm679_vm4, %v1016_v25 }
 0x54b   : > { %v884_v29 = vpop.permute.xlu0 %883  ;;  %v1159_v30 = vpop.xlane.xlu1 %1158 }
 0x54c   : > { %v886_v31 = vmul.f32 %v884_v29, %v880_v27  ;;  %v1160_v32 = vadd.f32 %v1159_v30, %v1156_v28  ;;  %v1738_v27 = vld [vmem:[#allocation23] ss:$0 sm:$0xff] }
 0x54d   : > { %v1383_v45 = vld [vmem:[#allocation4 + $0x8] sm:$0xff] }
 0x54e   : > { %v935_v33 = vadd.f32 %v929_v18, %v886_v31  ;;  %1161 = vst.msk [vmem:[#allocation4 + $0x10] sm:$0xff] %vm679_vm4, %v1160_v32 }
 0x54f   : > { %v1022_v36 = vpop.permute.xlu1 %1021  ;;  %v1166_v4 = vpop.permute.xlu0 %1165 }
 0x550   : > { %936 = vst.msk [vmem:[#allocation5] sm:$0xff] %vm809_vm2, %v935_v33 }
 0x553   : > { %v1309_v9 = vpop.permute.xlu0 %1308 }
 0x555   : > { %v1393_v34 = vld [vmem:[#allocation4 + $0x10] sm:$0xff] }
 0x556   : > { %2040 = vrcp.f32 %v1393_v34 }
 0x557   : > { %2042 = vrcp.f32 %v1383_v45  ;;  %v1018_v63 = vld [vmem:[#allocation5] sm:$0xff] }
 0x558   : > { %v1024_v1 = vmul.f32 %v1022_v36, %v1018_v63 }
 0x560   : > { %v2041_v35 = vpop.eup %2040 }
 0x561   : > { %1397 = vperm.xlu0 %2018, %v2041_v35   ;;  %v2043_v55 = vpop.eup %2042 }
 0x580   : > { %v1302_v39 = vpop.xlane.xlu1 %1301 }
 0x581   : > { %v1303_v40 = vadd.f32 %v1302_v39, %v1299_v38 }
 0x583   : > { %1304 = vst.msk [vmem:[#allocation4 + $0x18] sm:$0xff] %vm679_vm4, %v1303_v40 }
 0x584   : > { %v1378_v13 = vpop.permute.xlu0 %1377 }
 0x58a   : > { %v1069_v41 = vpop.f32.mrb[12].mxu0  ;;  %v1403_v50 = vld [vmem:[#allocation4 + $0x18] sm:$0xff] }
 0x58b   : > { %1076 = vrot.lane.b32.xlu1 %v1069_v41, %s2484_s28  ;;  %v1818_v42 = vpop.f32.mrb[13].mxu0  ;;  %2044 = vrcp.f32 %v1403_v50 }
 0x58c   : > { %v1072_v43 = vpop.f32.mrb[14].mxu0 }
 0x58d   : > { %v1819_v44 = vpop.f32.mrb[15].mxu0 }
 0x592   : > { %v1212_v46 = vpop.f32.mrb[16].mxu0 }
 0x593   : > { %1219 = vrot.lane.b32.xlu1 %v1212_v46, %s2485_s0  ;;  %v1830_v47 = vpop.f32.mrb[17].mxu0 }
 0x594   : > { %v1215_v48 = vpop.f32.mrb[18].mxu0 }
 0x595   : > { %v1831_v49 = vpop.f32.mrb[19].mxu0  ;;  %v2045_v56 = vpop.eup %2044 }
 0x59a   : > { %v1355_v51 = vpop.f32.mrb[20].mxu0 }
 0x59b   : > { %1362 = vrot.lane.b32.xlu1 %v1355_v51, %s2486_s26  ;;  %v1842_v52 = vpop.f32.mrb[21].mxu0 }
 0x59c   : > { %v1358_v53 = vpop.f32.mrb[22].mxu0 }
 0x59d   : > { %v1843_v54 = vpop.f32.mrb[23].mxu0 }
 0x59f   : > { %1387 = vperm.xlu1 %2017, %v2043_v55  }
 0x5a3   : > { %1407 = vperm.xlu1 %2017, %v2045_v56  }
 0x5e0   : > { %v1398_v19 = vpop.permute.xlu0 %1397 }
 0x5fd   : > { %v1077_v2 = vpop.permute.xlu1 %1076 }
 0x5fe   : > { %v1079_v3 = vadd.f32 %v1077_v2, %v1024_v1 }
 0x600   : > { %1081 = vst.msk [vmem:[#allocation5] sm:$0xff] %vm1080_vm6, %v1079_v3 }
 0x605   : > { %v1220_v7 = vpop.permute.xlu1 %1219 }
 0x607   : > { %v1162_v5 = vld [vmem:[#allocation5] sm:$0xff] }
 0x608   : > { %v1168_v6 = vmul.f32 %v1166_v4, %v1162_v5 }
 0x60a   : > { %v1222_v8 = vadd.f32 %v1220_v7, %v1168_v6 }
 0x60c   : > { %1224 = vst.msk [vmem:[#allocation5] sm:$0xff] %vm1223_vm7, %v1222_v8 }
 0x60d   : > { %v1363_v0 = vpop.permute.xlu1 %1362 }
 0x613   : > { %v1305_v10 = vld [vmem:[#allocation5] sm:$0xff] }
 0x614   : > { %v1311_v11 = vmul.f32 %v1309_v9, %v1305_v10 }
 0x616   : > { %v1365_v12 = vadd.f32 %v1363_v0, %v1311_v11 }
 0x618   : > { %1367 = vst.msk [vmem:[#allocation5] sm:$0xff] %vm1366_vm8, %v1365_v12 }
 0x61e   : > { %v1388_v17 = vpop.permute.xlu1 %1387 }
 0x61f   : > { %v1372_v14 = vld [vmem:[#allocation5] sm:$0xff] }
 0x620   : > { %v1380_v15 = vmul.f32 %v1378_v13, %v1372_v14 }
 0x622   : > { %1381 = vst.msk [vmem:[#allocation5] sm:$0xff] %vm809_vm2, %v1380_v15  ;;  %v1408_v23 = vpop.permute.xlu1 %1407 }
 0x629   : > { %v1382_v16 = vld [vmem:[#allocation5] sm:$0xff] }
 0x62a   : > { %v1390_v18 = vmul.f32 %v1388_v17, %v1382_v16 }
 0x62c   : > { %1391 = vst.msk [vmem:[#allocation5] sm:$0xff] %vm1080_vm6, %v1390_v18 }
 0x633   : > { %v1392_v20 = vld [vmem:[#allocation5] sm:$0xff] }
 0x634   : > { %v1400_v21 = vmul.f32 %v1398_v19, %v1392_v20 }
 0x636   : > { %1401 = vst.msk [vmem:[#allocation5] sm:$0xff] %vm1223_vm7, %v1400_v21 }
 0x63d   : > { %v1402_v22 = vld [vmem:[#allocation5] sm:$0xff] }
 0x63e   : > { %v1410_v24 = vmul.f32 %v1408_v23, %v1402_v22 }
 0x640   : > { %1411 = vst.msk [vmem:[#allocation5] sm:$0xff] %vm1366_vm8, %v1410_v24 }
 0x647   : > { %v1412_v25 = vld [vmem:[#allocation5] sm:$0xff] }
 0x648   : > { %v1413_v26 = vpack.c.bf16 %v1412_v25, %v1412_v25 }
 0x64a   : > { %1849 = vmatmul.mubr.msk.bf16.vlgmr.msra.gmra.mrb[20].mxu1 %vm631_vm0, %v1413_v26 }
 0x71d   : > { %v1464_v28 = vpop.f32.mrb[20].mxu1 }
 0x71e   : > { %v1465_v29 = vadd.f32 %v1738_v27, %v1464_v28  ;;  %v1850_v30 = vpop.f32.mrb[21].mxu1 }
 0x71f   : > { %v1467_v31 = vpop.f32.mrb[22].mxu1 }
 0x720   : > { %v1851_v32 = vpop.f32.mrb[23].mxu1  ;;  %1470 = vst.msk [vmem:[%s610_s16] sm:$0xff] %vm631_vm0, %v1465_v29 }
 0x721   : > { %2373 = shalt.err (!%p2370_p11)
}
 0x722   : > { %s2374_s7 = scalar_lea.hbm %s3118_s29, 128  ;;  %s2378_s28 = scalar_lea.hbm %s3251_s5, 256 }
 0x723   : > { %p2375_p13 = scmp.ne.s32.totalorder %s3118_s29, %s2374_s7  ;;  %p2379_p8 = scmp.lt.u32.totalorder %s3118_s29, %s3251_s5 }
 0x724   : > { %p2380_p12 = scmp.lt.u32.totalorder %s2378_s28, %s2374_s7  ;;  %p2382_p10 = scmp.lt.u32.totalorder %s2374_s7, %s3118_s29 }
 0x725   : > { %p2376_p2 = pnand %p2375_p13, %p3252_p3 }
 0x726   : > { %p2381_p9 = por %p2380_p12, %p2379_p8 }
 0x727   : > { %p2377_p4 = pneg %p2376_p2 }
 0x728   : > { %p2383_p1 = por %p2382_p10, %p2381_p9 }
 0x72a   : > { %p2384_p5 = pnand %p2383_p1, %p2377_p4 }
 0x72c   : > { %2387 = shalt.err (!%p2384_p5)
}
 0x72d   : > { %1890 = dma.vmem_to_hbm [thread:$0]  (%p3252_p3), %s3120_s27, 128, %s3118_s29, %s1472_s25  }
 0x72e PF: > { %s3253_s24 = sld [smem:[#allocation34_spill]]  ;;  %s1498_s12 = sand.u32 1, %s2442_s17  }
 0x72f   : > { %p3254_p0 = scmp.ne.s32.totalorder %s3226_s30, 0  ;;  %s1499_s16 = scalar_lea.sflag [#allocation8], %s1498_s12 }
 0x734   : > { %p3255_p6 = scmp.ge.s32.totalorder %s3253_s24, 2 }
 0x736   : > { %p1928_p7 = pnand %p3255_p6, %p3254_p0 }
 0x738   : > { %2437 = dma.done.wait (!%p1928_p7), %s1499_s16, 128  }
 0x739   : > { %2439 = vsyncadd (!%p1928_p7), %s1499_s16, 4294967168  ;;  %s34_s22 = sadd.s32 1, %s3253_s24   ;;  %s3256_s20 = sld [smem:[#allocation37_spill]] }
 0x73a   : > { %p31_p11 = scmp.ge.s32.totalorder %s34_s22, 4   ;;  %s3257_s3 = sld [smem:[#allocation33_spill]] }
 0x73b   : > { %s3258_s21 = sld [smem:[#allocation36_spill]]  ;;  %s3259_s17 = smov %s2446_s18 }
 0x73c   : > { %s3260_s18 = smov %s2450_s19  ;;  %33 = sbr.rel (!%p31_p11) target bundleno = 21 (0x15), region = 179 }
 0x73f   : > { %s3261_s19 = smov %s3256_s20 }
 0x740   : > { %s3262_s20 = smov %s3257_s3 }
 0x743   :  { %1504 = vsyncpa [#allocation7], 1 }
 0x744   :  { %1506 = vsyncpa [#allocation7 + $0x1], 1 }
 0x745   :  { %1507 = vsyncpa [#allocation10], 1 }
 0x746   :  { %1509 = vsyncpa [#allocation10 + $0x1], 1 }
 0x747   :  { %1510 = vsyncpa [#allocation13], 1 }
 0x748   :  { %1511 = vsyncpa [#allocation16], 1 }
 0x749   :  { %1512 = vsyncpa [#allocation19], 1 }
 0x74a   :  { %1513 = vsyncpa [#allocation22], 1 }
 0x74b   :  { %1514 = vsyncpa [#allocation8], 1 }
 0x74c   :  { %1516 = vsyncpa [#allocation8 + $0x1], 1 }

</bundles_post_ra>
